<compile_context>
chip_gen: v7x
topology: tpu7x:2x2x1
jax: 0.10.0
libtpu: 0.0.40
codegen_flags: <defaults>
</compile_context>

<pallas_src>
import functools
import math

import jax
import jax.numpy as jnp
from jax import lax
from jax.experimental import pallas as pl
from jax.experimental.pallas import tpu as pltpu


def _round_up(x, m):
    return ((x + m - 1) // m) * m


def _cdiv(a, b):
    return (a + b - 1) // b


def _largest_divisor_leq(n, cap):
    cap = max(1, min(n, cap))
    for d in range(cap, 0, -1):
        if n % d == 0:
            return d
    return 1


def _device_defaults():
    """Per-generation tiling / VMEM-budget defaults (safe fallbacks)."""
    kind = ""
    try:
        kind = jax.devices()[0].device_kind.lower()
    except Exception:
        pass
    if "v7" in kind:
        # v7x: 64 MiB physical VMEM, 2 TensorCores/chip -> >=2 batch tiles,
        # smaller batch tile, conservative VMEM budget.
        return dict(min_batch_tiles=2, b_tile_cap=64, vmem_cap=48 * 1024 * 1024)
    if kind:
        # v5e / v6e: 128 MiB physical VMEM, single TC -> keep big tiles.
        return dict(min_batch_tiles=1, b_tile_cap=128, vmem_cap=100 * 1024 * 1024)
    # Unknown device: conservative cap (verified to compile previously).
    return dict(min_batch_tiles=1, b_tile_cap=128, vmem_cap=64 * 1024 * 1024)


def textrcnn_kernel(embed_ref, wih_ref, b_ref, whh_f_ref, whh_b_ref,
                    fcw_x_ref, fcw_hf_ref, fcw_hb_ref, fcb_ref,
                    out_ref,
                    gxf_ref, gxb_ref, mxx_ref, mxhf_ref, mxhb_ref,
                    *, proj_chunk, unroll):
    T, Bt, EP = embed_ref.shape
    HP = whh_f_ref.shape[0]                      # padded hidden size (mult of 128)
    H4 = 4 * HP
    mm_dtype = wih_ref.dtype                     # matmul operand dtype (f32/bf16)

    # Scratch persists across grid steps: re-init running maxes per batch tile.
    # (0 is a valid identity since everything is post-ReLU.)
    mxx_ref[...] = jnp.zeros_like(mxx_ref)
    mxhf_ref[...] = jnp.zeros_like(mxhf_ref)
    mxhb_ref[...] = jnp.zeros_like(mxhb_ref)

    # ---- fused (fwd|bwd) input->hidden projection, chunked over T -----------
    # One (chunk*Bt, EP) @ (EP, 8HP) MXU matmul per chunk (bias folded in); the
    # two halves go to the fwd / bwd gate scratches.  Chunking bounds the
    # transient f32 result instead of materialising a (T*Bt, 8HP) intermediate.
    nchunks = T // proj_chunk
    rows = proj_chunk * Bt
    wih = wih_ref[...]                           # (EP, 8HP)
    bias = b_ref[...]                            # (1, 8HP) f32

    def proj_body(c, carry):
        t0 = c * proj_chunk
        xc = embed_ref[pl.ds(t0, proj_chunk)]    # (pc, Bt, EP)
        # running max-over-time of relu(embed) (decomposed from the concat)
        mxx_ref[...] = jnp.maximum(
            mxx_ref[...],
            jnp.max(jnp.maximum(xc, 0), axis=0).astype(jnp.float32))
        g = jnp.dot(xc.reshape(rows, EP).astype(mm_dtype), wih,
                    preferred_element_type=jnp.float32) + bias  # (rows, 8HP) f32
        gxf_ref[pl.ds(t0, proj_chunk)] = (
            g[:, :H4].astype(gxf_ref.dtype).reshape(proj_chunk, Bt, H4))
        gxb_ref[pl.ds(t0, proj_chunk)] = (
            g[:, H4:].astype(gxb_ref.dtype).reshape(proj_chunk, Bt, H4))
        return carry

    lax.fori_loop(0, nchunks, proj_body, 0)

    whh_f = whh_f_ref[...]                       # (HP, 4HP)
    whh_b = whh_b_ref[...]

    def lstm_step(gx_t, h, c, whh):
        # gates = x@W_ih + b (precomputed)  +  h@W_hh ; PyTorch order [i,f,g,o]
        gates = gx_t.astype(jnp.float32) + jnp.dot(
            h.astype(mm_dtype), whh, preferred_element_type=jnp.float32)
        sig_if = jax.nn.sigmoid(gates[:, 0:2 * HP])   # fused i|f sigmoid (EUP)
        i = sig_if[:, 0:HP]
        f = sig_if[:, HP:2 * HP]
        g = jnp.tanh(gates[:, 2 * HP:3 * HP])
        o = jax.nn.sigmoid(gates[:, 3 * HP:4 * HP])
        c_new = f * c + i * g
        h_new = o * jnp.tanh(c_new)
        return h_new, c_new

    z = jnp.zeros((Bt, HP), jnp.float32)

    # Forward and backward recurrences interleaved: two independent dependency
    # chains per iteration.  Running maxes live in VMEM scratch (not the carry)
    # to cut vreg pressure; carry is just the 4 recurrent states.
    def body(t, carry):
        h_f, c_f, h_b, c_b = carry
        h_f, c_f = lstm_step(gxf_ref[t], h_f, c_f, whh_f)
        mxhf_ref[...] = jnp.maximum(mxhf_ref[...], h_f)      # == max_t relu(h_f)
        h_b, c_b = lstm_step(gxb_ref[T - 1 - t], h_b, c_b, whh_b)
        mxhb_ref[...] = jnp.maximum(mxhb_ref[...], h_b)
        return (h_f, c_f, h_b, c_b)

    lax.fori_loop(0, T, body, (z, z, z, z), unroll=unroll)

    # ---- classifier: three partial dots against pre-split fc slabs ----------
    out_ref[...] = (
        jnp.dot(mxx_ref[...].astype(mm_dtype), fcw_x_ref[...],
                preferred_element_type=jnp.float32)
        + jnp.dot(mxhf_ref[...].astype(mm_dtype), fcw_hf_ref[...],
                  preferred_element_type=jnp.float32)
        + jnp.dot(mxhb_ref[...].astype(mm_dtype), fcw_hb_ref[...],
                  preferred_element_type=jnp.float32)
        + fcb_ref[...])


def textrcnn_forward(x_tokens, p, num_classes, *,
                     matmul_dtype=jnp.float32, gates_dtype=None,
                     min_batch_tiles=None, b_tile_cap=None,
                     vmem_limit_bytes=None, recurrence_unroll=1):
    B, T = x_tokens.shape
    E = p["embedding"].shape[1]
    H = p["w_hh_f"].shape[1]                     # w_hh_f is (4H, H)
    C = num_classes

    if gates_dtype is None:
        gates_dtype = matmul_dtype               # bf16 path: halves gate scratch

    dd = _device_defaults()
    if min_batch_tiles is None:
        min_batch_tiles = dd["min_batch_tiles"]
    if b_tile_cap is None:
        b_tile_cap = dd["b_tile_cap"]

    HP = _round_up(H, 128)                       # lane-aligned gate blocks
    CP = _round_up(C, 128)                       # lane-dense classifier output
    EP = _round_up(E, 128)                       # lane-aligned embed / MXU K

    # Balanced batch tiling: pick num_tiles first (>=2 on v7x so the "parallel"
    # grid axis feeds both TensorCores), then a sublane-aligned tile size.
    num_tiles = max(min_batch_tiles, _cdiv(B, b_tile_cap))
    B_TILE = _round_up(_cdiv(B, num_tiles), 8)
    B_pad = B_TILE * num_tiles

    # Time steps per input-projection chunk (bounds the transient f32 result).
    proj_chunk = _largest_divisor_leq(T, max(1, 1024 // B_TILE))

    # ---- glue: embedding gather, time-major layout, batch/E padding ---------
    embed = jnp.take(p["embedding"], x_tokens, axis=0)            # (B, T, E)
    embed = jnp.transpose(embed, (1, 0, 2)).astype(jnp.float32)   # (T, B, E)
    embed = jnp.pad(embed, ((0, 0), (0, B_pad - B), (0, EP - E)))
    embed = embed.astype(matmul_dtype)          # bf16 path: half the embed DMA

    # ---- glue: pad + pre-transpose LSTM weights (gate order i,f,g,o) --------
    def prep_dir(w_ih, w_hh, b_ih, b_hh):
        w_ih4 = w_ih.reshape(4, H, E)
        w_hh4 = w_hh.reshape(4, H, H)
        b4 = (b_ih + b_hh).reshape(4, H)
        w_ih_p = jnp.zeros((4, HP, EP), jnp.float32).at[:, :H, :E].set(w_ih4)
        w_hh_p = jnp.zeros((4, HP, HP), jnp.float32).at[:, :H, :H].set(w_hh4)
        b_p = jnp.zeros((4, HP), jnp.float32).at[:, :H].set(b4)
        wih_t = w_ih_p.reshape(4 * HP, EP).T.astype(matmul_dtype)   # (EP, 4HP)
        whh_t = w_hh_p.reshape(4 * HP, HP).T.astype(matmul_dtype)   # (HP, 4HP)
        return wih_t, whh_t, b_p.reshape(1, 4 * HP)                 # bias f32

    wih_f, whh_f, b_f = prep_dir(p["w_ih_f"], p["w_hh_f"],
                                 p["b_ih_f"], p["b_hh_f"])
    wih_b, whh_b, b_b = prep_dir(p["w_ih_b"], p["w_hh_b"],
                                 p["b_ih_b"], p["b_hh_b"])
    # Fused fwd|bwd input-projection weight / bias -> single big MXU matmul.
    wih = jnp.concatenate([wih_f, wih_b], axis=1)                   # (EP, 8HP)
    b_fb = jnp.concatenate([b_f, b_b], axis=1)                      # (1, 8HP)

    # ---- glue: split + pad + pre-transpose fc weights ------------------------
    fc_w = p["fc_w"]                                                # (C, E+2H)
    fcw_x = jnp.zeros((EP, CP), jnp.float32).at[:E, :C].set(fc_w[:, :E].T)
    fcw_hf = jnp.zeros((HP, CP), jnp.float32).at[:H, :C].set(fc_w[:, E:E + H].T)
    fcw_hb = jnp.zeros((HP, CP), jnp.float32).at[:H, :C].set(fc_w[:, E + H:].T)
    fcb = jnp.zeros((1, CP), jnp.float32).at[0, :C].set(p["fc_b"])
    fcw_x = fcw_x.astype(matmul_dtype)
    fcw_hf = fcw_hf.astype(matmul_dtype)
    fcw_hb = fcw_hb.astype(matmul_dtype)

    # ---- explicit VMEM budget (size buffers, then cap per generation) -------
    mm_bytes = jnp.dtype(matmul_dtype).itemsize
    g_bytes = jnp.dtype(gates_dtype).itemsize
    est = (
        2 * T * B_TILE * EP * mm_bytes                        # embed (dbl-buf)
        + 2 * (EP * 8 * HP + 2 * HP * 4 * HP                  # weights (dbl-buf)
               + EP * CP + 2 * HP * CP) * mm_bytes
        + 2 * (8 * HP + CP) * 4                               # biases (f32)
        + 2 * B_TILE * CP * 4                                 # output (dbl-buf)
        + 2 * T * B_TILE * 4 * HP * g_bytes                   # gxf + gxb scratch
        + B_TILE * (EP + 2 * HP) * 4                          # running maxes
    )
    if vmem_limit_bytes is None:
        vmem_limit_bytes = min(dd["vmem_cap"],
                               max(32 * 1024 * 1024, int(est * 1.5)))

    def full(shape):
        return pl.BlockSpec(shape, lambda i: (0,) * len(shape))

    kernel = functools.partial(textrcnn_kernel,
                               proj_chunk=proj_chunk,
                               unroll=recurrence_unroll)

    out = pl.pallas_call(
        kernel,
        out_shape=jax.ShapeDtypeStruct((B_pad, CP), jnp.float32),
        grid_spec=pltpu.PrefetchScalarGridSpec(
            num_scalar_prefetch=0,
            grid=(num_tiles,),
            in_specs=[
                pl.BlockSpec((T, B_TILE, EP), lambda i: (0, i, 0)),   # embed
                full((EP, 8 * HP)), full((1, 8 * HP)),                # wih, bias
                full((HP, 4 * HP)), full((HP, 4 * HP)),               # whh f/b
                full((EP, CP)), full((HP, CP)), full((HP, CP)), full((1, CP)),
            ],
            out_specs=pl.BlockSpec((B_TILE, CP), lambda i: (i, 0)),
            scratch_shapes=[
                pltpu.VMEM((T, B_TILE, 4 * HP), gates_dtype),  # fwd x-proj gates
                pltpu.VMEM((T, B_TILE, 4 * HP), gates_dtype),  # bwd x-proj gates
                pltpu.VMEM((B_TILE, EP), jnp.float32),         # max_t relu(x)
                pltpu.VMEM((B_TILE, HP), jnp.float32),         # max_t relu(h_fwd)
                pltpu.VMEM((B_TILE, HP), jnp.float32),         # max_t relu(h_bwd)
            ],
        ),
        compiler_params=pltpu.CompilerParams(
            dimension_semantics=("parallel",),
            vmem_limit_bytes=int(vmem_limit_bytes),
        ),
    )(embed, wih, b_fb, whh_f, whh_b, fcw_x, fcw_hf, fcw_hb, fcb)

    return out[:B, :C]


def init_params(key, vocab_size, num_classes, hidden_size, emb_size):
    H = hidden_size
    ks = jax.random.split(key, 11)
    std_l = 1.0 / math.sqrt(H)
    std_fc = 1.0 / math.sqrt(2 * H + emb_size)

    def u(k, shape, s):
        return jax.random.uniform(k, shape, jnp.float32, -s, s)

    emb = jax.random.normal(ks[0], (vocab_size, emb_size), jnp.float32)
    emb = emb.at[vocab_size - 1].set(0.0)                # padding_idx row
    return dict(
        embedding=emb,
        w_ih_f=u(ks[1], (4 * H, emb_size), std_l),
        w_hh_f=u(ks[2], (4 * H, H), std_l),
        b_ih_f=u(ks[3], (4 * H,), std_l),
        b_hh_f=u(ks[4], (4 * H,), std_l),
        w_ih_b=u(ks[5], (4 * H, emb_size), std_l),
        w_hh_b=u(ks[6], (4 * H, H), std_l),
        b_ih_b=u(ks[7], (4 * H,), std_l),
        b_hh_b=u(ks[8], (4 * H,), std_l),
        fc_w=u(ks[9], (num_classes, 2 * H + emb_size), std_fc),
        fc_b=u(ks[10], (num_classes,), std_fc),
    )


def reference_forward(x_tokens, p):
    """Pure-JAX reference replicating the PyTorch forward."""
    embed = p["embedding"][x_tokens]                     # (B, T, E)
    B, T, E = embed.shape
    H = p["w_hh_f"].shape[1]

    def run_dir(xs, wih, whh, bih, bhh):
        def step(carry, x_t):
            h, c = carry
            gates = x_t @ wih.T + h @ whh.T + bih + bhh
            i = jax.nn.sigmoid(gates[:, 0:H])
            f = jax.nn.sigmoid(gates[:, H:2 * H])
            g = jnp.tanh(gates[:, 2 * H:3 * H])
            o = jax.nn.sigmoid(gates[:, 3 * H:4 * H])
            c = f * c + i * g
            h = o * jnp.tanh(c)
            return (h, c), h
        init = (jnp.zeros((B, H), jnp.float32), jnp.zeros((B, H), jnp.float32))
        _, hs = lax.scan(step, init, jnp.transpose(xs, (1, 0, 2)))
        return jnp.transpose(hs, (1, 0, 2))              # (B, T, H)

    h_f = run_dir(embed, p["w_ih_f"], p["w_hh_f"], p["b_ih_f"], p["b_hh_f"])
    h_b = run_dir(embed[:, ::-1], p["w_ih_b"], p["w_hh_b"],
                  p["b_ih_b"], p["b_hh_b"])[:, ::-1]
    out = jnp.concatenate([embed, h_f, h_b], axis=2)     # (B, T, E+2H)
    out = jax.nn.relu(out)
    out = jnp.max(out, axis=1)                           # maxpool over T + squeeze
    return out @ p["fc_w"].T + p["fc_b"]


if __name__ == "__main__":
    vocab_size, num_classes, hidden_size, emb_size, pad_size = 50, 5, 16, 32, 8
    batch = 2

    key = jax.random.PRNGKey(0)
    kp, kx = jax.random.split(key)
    params = init_params(kp, vocab_size, num_classes, hidden_size, emb_size)
    x = jax.random.randint(kx, (batch, pad_size), 0, vocab_size, dtype=jnp.int32)

    ref = reference_forward(x, params)

    # f32 MXU-operand path: same math as the reference, tight tolerance.
    out = jax.block_until_ready(textrcnn_forward(x, params, num_classes))
    assert out.shape == (batch, num_classes)
    assert jnp.allclose(out, ref, atol=1e-4, rtol=1e-4), (out, ref)

    # unroll=2 sweep knob: identical semantics.
    out_u2 = jax.block_until_ready(
        textrcnn_forward(x, params, num_classes, recurrence_unroll=2))
    assert jnp.allclose(out_u2, ref, atol=1e-4, rtol=1e-4), (out_u2, ref)

    # bf16 MXU operands + bf16 embed DMA + bf16 gate scratch (f32 accumulation
    # and f32 elementwise gate math): loose tolerance.
    out_bf16 = jax.block_until_ready(
        textrcnn_forward(x, params, num_classes, matmul_dtype=jnp.bfloat16))
    assert out_bf16.shape == (batch, num_classes)
    assert jnp.allclose(out_bf16, ref, atol=2e-1, rtol=2e-1), (out_bf16, ref)

    print("KERNEL_OK")
</pallas_src>

<mosaic_0001>
module attributes {stable_mosaic.version = 11 : i64} {
  func.func @textrcnn_kernel(%arg0: i32, %arg1: memref<8x8x128xf32, #tpu.memory_space<vmem>>, %arg2: memref<128x1024xf32, #tpu.memory_space<vmem>>, %arg3: memref<1x1024xf32, #tpu.memory_space<vmem>>, %arg4: memref<128x512xf32, #tpu.memory_space<vmem>>, %arg5: memref<128x512xf32, #tpu.memory_space<vmem>>, %arg6: memref<128x128xf32, #tpu.memory_space<vmem>>, %arg7: memref<128x128xf32, #tpu.memory_space<vmem>>, %arg8: memref<128x128xf32, #tpu.memory_space<vmem>>, %arg9: memref<1x128xf32, #tpu.memory_space<vmem>>, %arg10: memref<8x128xf32, #tpu.memory_space<vmem>>, %arg11: memref<8x8x512xf32, #tpu.memory_space<vmem>>, %arg12: memref<8x8x512xf32, #tpu.memory_space<vmem>>, %arg13: memref<8x128xf32, #tpu.memory_space<vmem>>, %arg14: memref<8x128xf32, #tpu.memory_space<vmem>>, %arg15: memref<8x128xf32, #tpu.memory_space<vmem>>) attributes {dimension_semantics = [#tpu.dimension_semantics<parallel>], iteration_bounds = array<i64: 1>, scalar_prefetch = 0 : i64, scratch_operands = 5 : i64, tpu.core_type = #tpu.core_type<tc>, window_params = [{transform_indices = @transform_0, window_bounds = array<i64: 8, 8, 128>}, {pipeline_mode = #tpu.pipeline_mode<synchronous>, transform_indices = @transform_1, window_bounds = array<i64: 128, 1024>}, {pipeline_mode = #tpu.pipeline_mode<synchronous>, transform_indices = @transform_2, window_bounds = array<i64: 1, 1024>}, {pipeline_mode = #tpu.pipeline_mode<synchronous>, transform_indices = @transform_3, window_bounds = array<i64: 128, 512>}, {pipeline_mode = #tpu.pipeline_mode<synchronous>, transform_indices = @transform_4, window_bounds = array<i64: 128, 512>}, {pipeline_mode = #tpu.pipeline_mode<synchronous>, transform_indices = @transform_5, window_bounds = array<i64: 128, 128>}, {pipeline_mode = #tpu.pipeline_mode<synchronous>, transform_indices = @transform_6, window_bounds = array<i64: 128, 128>}, {pipeline_mode = #tpu.pipeline_mode<synchronous>, transform_indices = @transform_7, window_bounds = array<i64: 128, 128>}, {pipeline_mode = #tpu.pipeline_mode<synchronous>, transform_indices = @transform_8, window_bounds = array<i64: 1, 128>}, {transform_indices = @transform_9, window_bounds = array<i64: 8, 128>}]} {
    %cst = arith.constant 0.000000e+00 : f32
    %0 = vector.broadcast %cst : f32 to vector<8x128xf32>
    %c0 = arith.constant 0 : index
    %c0_0 = arith.constant 0 : index
    %1 = vector.load %arg13[%c0, %c0_0] : memref<8x128xf32, #tpu.memory_space<vmem>>, vector<8x128xf32>
    tpu.vector_store %arg13[%c0, %c0_0], %0 {strides = array<i32>} : memref<8x128xf32, #tpu.memory_space<vmem>>, vector<8x128xf32>,
    %cst_1 = arith.constant 0.000000e+00 : f32
    %2 = vector.broadcast %cst_1 : f32 to vector<8x128xf32>
    %c0_2 = arith.constant 0 : index
    %c0_3 = arith.constant 0 : index
    %3 = vector.load %arg14[%c0_2, %c0_3] : memref<8x128xf32, #tpu.memory_space<vmem>>, vector<8x128xf32>
    tpu.vector_store %arg14[%c0_2, %c0_3], %2 {strides = array<i32>} : memref<8x128xf32, #tpu.memory_space<vmem>>, vector<8x128xf32>,
    %cst_4 = arith.constant 0.000000e+00 : f32
    %4 = vector.broadcast %cst_4 : f32 to vector<8x128xf32>
    %c0_5 = arith.constant 0 : index
    %c0_6 = arith.constant 0 : index
    %5 = vector.load %arg15[%c0_5, %c0_6] : memref<8x128xf32, #tpu.memory_space<vmem>>, vector<8x128xf32>
    tpu.vector_store %arg15[%c0_5, %c0_6], %4 {strides = array<i32>} : memref<8x128xf32, #tpu.memory_space<vmem>>, vector<8x128xf32>,
    %c0_7 = arith.constant 0 : index
    %c0_8 = arith.constant 0 : index
    %6 = vector.load %arg2[%c0_7, %c0_8] : memref<128x1024xf32, #tpu.memory_space<vmem>>, vector<128x1024xf32>
    %c0_9 = arith.constant 0 : index
    %c0_10 = arith.constant 0 : index
    %7 = vector.load %arg3[%c0_9, %c0_10] : memref<1x1024xf32, #tpu.memory_space<vmem>>, vector<1x1024xf32>
    %c0_i32 = arith.constant 0 : i32
    %c8_i32 = arith.constant 8 : i32
    %8 = arith.muli %c0_i32, %c8_i32 : i32
    %9 = arith.index_cast %8 : i32 to index
    %c0_11 = arith.constant 0 : index
    %c0_12 = arith.constant 0 : index
    %10 = vector.load %arg1[%9, %c0_11, %c0_12] : memref<8x8x128xf32, #tpu.memory_space<vmem>>, vector<8x8x128xf32>
    %c0_13 = arith.constant 0 : index
    %c0_14 = arith.constant 0 : index
    %11 = vector.load %arg13[%c0_13, %c0_14] : memref<8x128xf32, #tpu.memory_space<vmem>>, vector<8x128xf32>
    %cst_15 = arith.constant 0.000000e+00 : f32
    %12 = vector.broadcast %cst_15 : f32 to vector<8x8x128xf32>
    %13 = arith.maximumf %10, %12 : vector<8x8x128xf32>
    %cst_16 = arith.constant dense<0xFF800000> : vector<8x128xf32>
    %14 = vector.multi_reduction <maximumf>, %13, %cst_16 [0] : vector<8x8x128xf32> to vector<8x128xf32>
    %15 = arith.maximumf %11, %14 : vector<8x128xf32>
    %c0_17 = arith.constant 0 : index
    %c0_18 = arith.constant 0 : index
    %16 = vector.load %arg13[%c0_17, %c0_18] : memref<8x128xf32, #tpu.memory_space<vmem>>, vector<8x128xf32>
    tpu.vector_store %arg13[%c0_17, %c0_18], %15 {strides = array<i32>} : memref<8x128xf32, #tpu.memory_space<vmem>>, vector<8x128xf32>,
    %17 = vector.shape_cast %10 : vector<8x8x128xf32> to vector<64x128xf32>
    %cst_19 = arith.constant dense<0.000000e+00> : vector<64x1024xf32>
    %18 = tpu.matmul %17, %6, %cst_19 {dimension_numbers = #tpu.dot_dimension_numbers<[1], [0], [0], [1], [0, 0, 1, 1], [], []>} : vector<64x128xf32>, vector<128x1024xf32>, vector<64x1024xf32> -> vector<64x1024xf32>
    %19 = vector.broadcast %7 : vector<1x1024xf32> to vector<64x1024xf32>
    %20 = arith.addf %18, %19 : vector<64x1024xf32>
    %21 = vector.extract_strided_slice %20 {offsets = [0, 0], sizes = [64, 512], strides = [1, 1]} : vector<64x1024xf32> to vector<64x512xf32>
    %22 = vector.shape_cast %21 : vector<64x512xf32> to vector<8x8x512xf32>
    %23 = arith.index_cast %8 : i32 to index
    %c0_20 = arith.constant 0 : index
    %c0_21 = arith.constant 0 : index
    %24 = vector.load %arg11[%23, %c0_20, %c0_21] : memref<8x8x512xf32, #tpu.memory_space<vmem>>, vector<8x8x512xf32>
    tpu.vector_store %arg11[%23, %c0_20, %c0_21], %22 {strides = array<i32>} : memref<8x8x512xf32, #tpu.memory_space<vmem>>, vector<8x8x512xf32>,
    %25 = vector.extract_strided_slice %20 {offsets = [0, 512], sizes = [64, 512], strides = [1, 1]} : vector<64x1024xf32> to vector<64x512xf32>
    %26 = vector.shape_cast %25 : vector<64x512xf32> to vector<8x8x512xf32>
    %27 = arith.index_cast %8 : i32 to index
    %c0_22 = arith.constant 0 : index
    %c0_23 = arith.constant 0 : index
    %28 = vector.load %arg12[%27, %c0_22, %c0_23] : memref<8x8x512xf32, #tpu.memory_space<vmem>>, vector<8x8x512xf32>
    tpu.vector_store %arg12[%27, %c0_22, %c0_23], %26 {strides = array<i32>} : memref<8x8x512xf32, #tpu.memory_space<vmem>>, vector<8x8x512xf32>,
    %c1_i32 = arith.constant 1 : i32
    %c0_24 = arith.constant 0 : index
    %c0_25 = arith.constant 0 : index
    %29 = vector.load %arg4[%c0_24, %c0_25] : memref<128x512xf32, #tpu.memory_space<vmem>>, vector<128x512xf32>
    %c0_26 = arith.constant 0 : index
    %c0_27 = arith.constant 0 : index
    %30 = vector.load %arg5[%c0_26, %c0_27] : memref<128x512xf32, #tpu.memory_space<vmem>>, vector<128x512xf32>
    %cst_28 = arith.constant 0.000000e+00 : f32
    %31 = vector.broadcast %cst_28 : f32 to vector<8x128xf32>
    %c0_i32_29 = arith.constant 0 : i32
    %c8_i32_30 = arith.constant 8 : i32
    %32 = arith.addi %c0_i32_29, %c8_i32_30 : i32
    %c1_i32_31 = arith.constant 1 : i32
    %33:4 = scf.for %arg16 = %c0_i32_29 to %32 step %c1_i32_31 iter_args(%arg17 = %31, %arg18 = %31, %arg19 = %31, %arg20 = %31) -> (vector<8x128xf32>, vector<8x128xf32>, vector<8x128xf32>, vector<8x128xf32>)  : i32 {
      %49 = arith.index_cast %arg16 : i32 to index
      %c0_52 = arith.constant 0 : index
      %c0_53 = arith.constant 0 : index
      %50 = vector.load %arg11[%49, %c0_52, %c0_53] : memref<8x8x512xf32, #tpu.memory_space<vmem>>, vector<1x8x512xf32>
      %51 = vector.shape_cast %50 : vector<1x8x512xf32> to vector<8x512xf32>
      %cst_54 = arith.constant dense<0.000000e+00> : vector<8x512xf32>
      %52 = tpu.matmul %arg17, %29, %cst_54 {dimension_numbers = #tpu.dot_dimension_numbers<[1], [0], [0], [1], [0, 0, 1, 1], [], []>} : vector<8x128xf32>, vector<128x512xf32>, vector<8x512xf32> -> vector<8x512xf32>
      %53 = arith.addf %51, %52 : vector<8x512xf32>
      %54 = vector.extract_strided_slice %53 {offsets = [0, 0], sizes = [8, 256], strides = [1, 1]} : vector<8x512xf32> to vector<8x256xf32>
      %55 = arith.negf %54 : vector<8x256xf32>
      %56 = math.exp %55 : vector<8x256xf32>
      %cst_55 = arith.constant 1.000000e+00 : f32
      %57 = vector.broadcast %cst_55 : f32 to vector<8x256xf32>
      %58 = arith.addf %57, %56 : vector<8x256xf32>
      %59 = arith.divf %57, %58 : vector<8x256xf32>
      %60 = vector.extract_strided_slice %59 {offsets = [0, 0], sizes = [8, 128], strides = [1, 1]} : vector<8x256xf32> to vector<8x128xf32>
      %61 = vector.extract_strided_slice %59 {offsets = [0, 128], sizes = [8, 128], strides = [1, 1]} : vector<8x256xf32> to vector<8x128xf32>
      %62 = vector.extract_strided_slice %53 {offsets = [0, 256], sizes = [8, 128], strides = [1, 1]} : vector<8x512xf32> to vector<8x128xf32>
      %63 = math.tanh %62 : vector<8x128xf32>
      %64 = vector.extract_strided_slice %53 {offsets = [0, 384], sizes = [8, 128], strides = [1, 1]} : vector<8x512xf32> to vector<8x128xf32>
      %65 = arith.negf %64 : vector<8x128xf32>
      %66 = math.exp %65 : vector<8x128xf32>
      %cst_56 = arith.constant 1.000000e+00 : f32
      %67 = vector.broadcast %cst_56 : f32 to vector<8x128xf32>
      %68 = arith.addf %67, %66 : vector<8x128xf32>
      %69 = arith.divf %67, %68 : vector<8x128xf32>
      %70 = arith.mulf %61, %arg18 : vector<8x128xf32>
      %71 = arith.mulf %60, %63 : vector<8x128xf32>
      %72 = arith.addf %70, %71 : vector<8x128xf32>
      %73 = math.tanh %72 : vector<8x128xf32>
      %74 = arith.mulf %69, %73 : vector<8x128xf32>
      %c0_57 = arith.constant 0 : index
      %c0_58 = arith.constant 0 : index
      %75 = vector.load %arg14[%c0_57, %c0_58] : memref<8x128xf32, #tpu.memory_space<vmem>>, vector<8x128xf32>
      %76 = arith.maximumf %75, %74 : vector<8x128xf32>
      %c0_59 = arith.constant 0 : index
      %c0_60 = arith.constant 0 : index
      %77 = vector.load %arg14[%c0_59, %c0_60] : memref<8x128xf32, #tpu.memory_space<vmem>>, vector<8x128xf32>
      tpu.vector_store %arg14[%c0_59, %c0_60], %76 {strides = array<i32>} : memref<8x128xf32, #tpu.memory_space<vmem>>, vector<8x128xf32>,
      %c7_i32 = arith.constant 7 : i32
      %78 = arith.subi %c7_i32, %arg16 : i32
      %79 = arith.index_cast %78 : i32 to index
      %c0_61 = arith.constant 0 : index
      %c0_62 = arith.constant 0 : index
      %80 = vector.load %arg12[%79, %c0_61, %c0_62] : memref<8x8x512xf32, #tpu.memory_space<vmem>>, vector<1x8x512xf32>
      %81 = vector.shape_cast %80 : vector<1x8x512xf32> to vector<8x512xf32>
      %cst_63 = arith.constant dense<0.000000e+00> : vector<8x512xf32>
      %82 = tpu.matmul %arg19, %30, %cst_63 {dimension_numbers = #tpu.dot_dimension_numbers<[1], [0], [0], [1], [0, 0, 1, 1], [], []>} : vector<8x128xf32>, vector<128x512xf32>, vector<8x512xf32> -> vector<8x512xf32>
      %83 = arith.addf %81, %82 : vector<8x512xf32>
      %84 = vector.extract_strided_slice %83 {offsets = [0, 0], sizes = [8, 256], strides = [1, 1]} : vector<8x512xf32> to vector<8x256xf32>
      %85 = arith.negf %84 : vector<8x256xf32>
      %86 = math.exp %85 : vector<8x256xf32>
      %cst_64 = arith.constant 1.000000e+00 : f32
      %87 = vector.broadcast %cst_64 : f32 to vector<8x256xf32>
      %88 = arith.addf %87, %86 : vector<8x256xf32>
      %89 = arith.divf %87, %88 : vector<8x256xf32>
      %90 = vector.extract_strided_slice %89 {offsets = [0, 0], sizes = [8, 128], strides = [1, 1]} : vector<8x256xf32> to vector<8x128xf32>
      %91 = vector.extract_strided_slice %89 {offsets = [0, 128], sizes = [8, 128], strides = [1, 1]} : vector<8x256xf32> to vector<8x128xf32>
      %92 = vector.extract_strided_slice %83 {offsets = [0, 256], sizes = [8, 128], strides = [1, 1]} : vector<8x512xf32> to vector<8x128xf32>
      %93 = math.tanh %92 : vector<8x128xf32>
      %94 = vector.extract_strided_slice %83 {offsets = [0, 384], sizes = [8, 128], strides = [1, 1]} : vector<8x512xf32> to vector<8x128xf32>
      %95 = arith.negf %94 : vector<8x128xf32>
      %96 = math.exp %95 : vector<8x128xf32>
      %cst_65 = arith.constant 1.000000e+00 : f32
      %97 = vector.broadcast %cst_65 : f32 to vector<8x128xf32>
      %98 = arith.addf %97, %96 : vector<8x128xf32>
      %99 = arith.divf %97, %98 : vector<8x128xf32>
      %100 = arith.mulf %91, %arg20 : vector<8x128xf32>
      %101 = arith.mulf %90, %93 : vector<8x128xf32>
      %102 = arith.addf %100, %101 : vector<8x128xf32>
      %103 = math.tanh %102 : vector<8x128xf32>
      %104 = arith.mulf %99, %103 : vector<8x128xf32>
      %c0_66 = arith.constant 0 : index
      %c0_67 = arith.constant 0 : index
      %105 = vector.load %arg15[%c0_66, %c0_67] : memref<8x128xf32, #tpu.memory_space<vmem>>, vector<8x128xf32>
      %106 = arith.maximumf %105, %104 : vector<8x128xf32>
      %c0_68 = arith.constant 0 : index
      %c0_69 = arith.constant 0 : index
      %107 = vector.load %arg15[%c0_68, %c0_69] : memref<8x128xf32, #tpu.memory_space<vmem>>, vector<8x128xf32>
      tpu.vector_store %arg15[%c0_68, %c0_69], %106 {strides = array<i32>} : memref<8x128xf32, #tpu.memory_space<vmem>>, vector<8x128xf32>,
      scf.yield %74, %72, %104, %102 : vector<8x128xf32>, vector<8x128xf32>, vector<8x128xf32>, vector<8x128xf32>
    }
    %c8_i32_32 = arith.constant 8 : i32
    %c0_33 = arith.constant 0 : index
    %c0_34 = arith.constant 0 : index
    %34 = vector.load %arg13[%c0_33, %c0_34] : memref<8x128xf32, #tpu.memory_space<vmem>>, vector<8x128xf32>
    %c0_35 = arith.constant 0 : index
    %c0_36 = arith.constant 0 : index
    %35 = vector.load %arg6[%c0_35, %c0_36] : memref<128x128xf32, #tpu.memory_space<vmem>>, vector<128x128xf32>
    %cst_37 = arith.constant dense<0.000000e+00> : vector<8x128xf32>
    %36 = tpu.matmul %34, %35, %cst_37 {dimension_numbers = #tpu.dot_dimension_numbers<[1], [0], [0], [1], [0, 0, 1, 1], [], []>} : vector<8x128xf32>, vector<128x128xf32>, vector<8x128xf32> -> vector<8x128xf32>
    %c0_38 = arith.constant 0 : index
    %c0_39 = arith.constant 0 : index
    %37 = vector.load %arg14[%c0_38, %c0_39] : memref<8x128xf32, #tpu.memory_space<vmem>>, vector<8x128xf32>
    %c0_40 = arith.constant 0 : index
    %c0_41 = arith.constant 0 : index
    %38 = vector.load %arg7[%c0_40, %c0_41] : memref<128x128xf32, #tpu.memory_space<vmem>>, vector<128x128xf32>
    %cst_42 = arith.constant dense<0.000000e+00> : vector<8x128xf32>
    %39 = tpu.matmul %37, %38, %cst_42 {dimension_numbers = #tpu.dot_dimension_numbers<[1], [0], [0], [1], [0, 0, 1, 1], [], []>} : vector<8x128xf32>, vector<128x128xf32>, vector<8x128xf32> -> vector<8x128xf32>
    %40 = arith.addf %36, %39 : vector<8x128xf32>
    %c0_43 = arith.constant 0 : index
    %c0_44 = arith.constant 0 : index
    %41 = vector.load %arg15[%c0_43, %c0_44] : memref<8x128xf32, #tpu.memory_space<vmem>>, vector<8x128xf32>
    %c0_45 = arith.constant 0 : index
    %c0_46 = arith.constant 0 : index
    %42 = vector.load %arg8[%c0_45, %c0_46] : memref<128x128xf32, #tpu.memory_space<vmem>>, vector<128x128xf32>
    %cst_47 = arith.constant dense<0.000000e+00> : vector<8x128xf32>
    %43 = tpu.matmul %41, %42, %cst_47 {dimension_numbers = #tpu.dot_dimension_numbers<[1], [0], [0], [1], [0, 0, 1, 1], [], []>} : vector<8x128xf32>, vector<128x128xf32>, vector<8x128xf32> -> vector<8x128xf32>
    %44 = arith.addf %40, %43 : vector<8x128xf32>
    %c0_48 = arith.constant 0 : index
    %c0_49 = arith.constant 0 : index
    %45 = vector.load %arg9[%c0_48, %c0_49] : memref<1x128xf32, #tpu.memory_space<vmem>>, vector<1x128xf32>
    %46 = vector.broadcast %45 : vector<1x128xf32> to vector<8x128xf32>
    %47 = arith.addf %44, %46 : vector<8x128xf32>
    %c0_50 = arith.constant 0 : index
    %c0_51 = arith.constant 0 : index
    %48 = vector.load %arg10[%c0_50, %c0_51] : memref<8x128xf32, #tpu.memory_space<vmem>>, vector<8x128xf32>
    tpu.vector_store %arg10[%c0_50, %c0_51], %47 {strides = array<i32>} : memref<8x128xf32, #tpu.memory_space<vmem>>, vector<8x128xf32>,
    return
  }
  func.func @transform_0(%arg0: i32) -> (i32, i32, i32) {
    %c0_i32 = arith.constant 0 : i32
    %c0_i32_0 = arith.constant 0 : i32
    %c0_i32_1 = arith.constant 0 : i32
    return %c0_i32, %arg0, %c0_i32_0 : i32, i32, i32
  }
  func.func @transform_1(%arg0: i32) -> (i32, i32) {
    %c0_i32 = arith.constant 0 : i32
    %c0_i32_0 = arith.constant 0 : i32
    %c0_i32_1 = arith.constant 0 : i32
    return %c0_i32, %c0_i32_0 : i32, i32
  }
  func.func @transform_2(%arg0: i32) -> (i32, i32) {
    %c0_i32 = arith.constant 0 : i32
    %c0_i32_0 = arith.constant 0 : i32
    %c0_i32_1 = arith.constant 0 : i32
    return %c0_i32, %c0_i32_0 : i32, i32
  }
  func.func @transform_3(%arg0: i32) -> (i32, i32) {
    %c0_i32 = arith.constant 0 : i32
    %c0_i32_0 = arith.constant 0 : i32
    %c0_i32_1 = arith.constant 0 : i32
    return %c0_i32, %c0_i32_0 : i32, i32
  }
  func.func @transform_4(%arg0: i32) -> (i32, i32) {
    %c0_i32 = arith.constant 0 : i32
    %c0_i32_0 = arith.constant 0 : i32
    %c0_i32_1 = arith.constant 0 : i32
    return %c0_i32, %c0_i32_0 : i32, i32
  }
  func.func @transform_5(%arg0: i32) -> (i32, i32) {
    %c0_i32 = arith.constant 0 : i32
    %c0_i32_0 = arith.constant 0 : i32
    %c0_i32_1 = arith.constant 0 : i32
    return %c0_i32, %c0_i32_0 : i32, i32
  }
  func.func @transform_6(%arg0: i32) -> (i32, i32) {
    %c0_i32 = arith.constant 0 : i32
    %c0_i32_0 = arith.constant 0 : i32
    %c0_i32_1 = arith.constant 0 : i32
    return %c0_i32, %c0_i32_0 : i32, i32
  }
  func.func @transform_7(%arg0: i32) -> (i32, i32) {
    %c0_i32 = arith.constant 0 : i32
    %c0_i32_0 = arith.constant 0 : i32
    %c0_i32_1 = arith.constant 0 : i32
    return %c0_i32, %c0_i32_0 : i32, i32
  }
  func.func @transform_8(%arg0: i32) -> (i32, i32) {
    %c0_i32 = arith.constant 0 : i32
    %c0_i32_0 = arith.constant 0 : i32
    %c0_i32_1 = arith.constant 0 : i32
    return %c0_i32, %c0_i32_0 : i32, i32
  }
  func.func @transform_9(%arg0: i32) -> (i32, i32) {
    %c0_i32 = arith.constant 0 : i32
    %c0_i32_0 = arith.constant 0 : i32
    return %arg0, %c0_i32 : i32, i32
  }
}

</mosaic_0001>

<bundles_post_ra>
// kernel: tpu_custom_call.1
= control target key start
LH: loop header
LB: loop body
LE: loop exit
PB: predicated region body
PF: predicated region fallthrough
CT: control target
= control target key end

     0   :  { %14 = vsyncpa [#allocation8], 0  ;;  %s3374_s0 = inlined_call_operand.hbm [shape: f32[8,8,128], index: 0, kind: input, shape index: {}]   ;;  %s3375_s1 = inlined_call_operand.hbm [shape: f32[128,1024], index: 1, kind: input, shape index: {}]   ;;  %s3376_s2 = inlined_call_operand.hbm [shape: f32[1,1024], index: 2, kind: input, shape index: {}]   ;;  %s3377_s3 = inlined_call_operand.hbm [shape: f32[128,512], index: 3, kind: input, shape index: {}]   ;;  %s3378_s4 = inlined_call_operand.hbm [shape: f32[128,512], index: 4, kind: input, shape index: {}]   ;;  %s3379_s5 = inlined_call_operand.hbm [shape: f32[128,128], index: 5, kind: input, shape index: {}]   ;;  %s3380_s6 = inlined_call_operand.hbm [shape: f32[128,128], index: 6, kind: input, shape index: {}]   ;;  %s3381_s7 = inlined_call_operand.hbm [shape: f32[128,128], index: 7, kind: input, shape index: {}]   ;;  %s3382_s8 = inlined_call_operand.vmem [shape: f32[1,128], index: 8, kind: input, shape index: {}]   ;;  %s3383_s9 = inlined_call_operand.hbm [shape: f32[8,128], index: 9, kind: output, shape index: {}]  }
   0x1   :  { %15 = vsyncpa [#allocation11], 0 }
   0x2   :  { %16 = vsyncpa [#allocation14], 0 }
   0x3   :  { %17 = vsyncpa [#allocation17], 0 }
   0x4   :  { %18 = vsyncpa [#allocation20], 0 }
   0x5   :  { %19 = vsyncpa [#allocation9], 0  ;;  %s2503_s30 = smov [#allocation10]   ;;  %s2253_s13 = scalar_lea.hbm %s3375_s1, 16384 }
   0x6   :  { %s37_s10 = sshll.u32 %s2503_s30, 4  ;;  %p2254_p0 = scmp.ne.s32.totalorder %s3375_s1, %s2253_s13  ;;  %s38_s10 = int_to_ptr.vmem [resolvable:$true] %s37_s10 }
   0x7   :  { %p2257_p1 = scmp.lt.u32.totalorder %s2253_s13, %s3375_s1 }
   0x9   :  { %p2259_p2 = pnand %p2257_p1, %p2254_p0 }
   0xb   :  { %2262 = shalt.err (!%p2259_p2)
}
   0xc   :  { %s2263_s18 = scalar_lea.vmem %s38_s10, 16384  ;;  %p2268_p4 = scmp.lt.s32.totalorder %s38_s10, %s38_s10 }
   0xd   :  { %p2264_p3 = scmp.ne.s32.totalorder %s38_s10, %s2263_s18  ;;  %p2269_p5 = scmp.lt.s32.totalorder %s2263_s18, %s2263_s18 }
   0xf   :  { %p2270_p6 = por %p2269_p5, %p2268_p4 }
  0x11   :  { %p2271_p7 = pnand %p2270_p6, %p2264_p3 }
  0x13   :  { %2274 = shalt.err (!%p2271_p7)
}
  0x14   :  { %s2504_s19 = smov 1024   ;;  %s2505_s20 = smov 64  }
  0x15   :  { %43 = dma.hbm_to_vmem [thread:$0]  %s3375_s1, 16384, %s38_s10, [#allocation11], %s2504_s19, %s2504_s19, %s2505_s20  }
  0x16   :  { %s2506_s23 = smov [#allocation13]   ;;  %s2275_s27 = scalar_lea.hbm %s3377_s3, 8192 }
  0x17   :  { %s59_s24 = sshll.u32 %s2506_s23, 4  ;;  %p2276_p8 = scmp.ne.s32.totalorder %s3377_s3, %s2275_s27  ;;  %s60_s24 = int_to_ptr.vmem [resolvable:$true] %s59_s24 }
  0x18   :  { %p2279_p9 = scmp.lt.u32.totalorder %s2275_s27, %s3377_s3 }
  0x1a   :  { %p2281_p10 = pnand %p2279_p9, %p2276_p8 }
  0x1c   :  { %2284 = shalt.err (!%p2281_p10)
}
  0x1d   :  { %s2285_s12 = scalar_lea.vmem %s60_s24, 8192  ;;  %p2290_p12 = scmp.lt.s32.totalorder %s60_s24, %s60_s24 }
  0x1e   :  { %p2286_p11 = scmp.ne.s32.totalorder %s60_s24, %s2285_s12  ;;  %p2291_p13 = scmp.lt.s32.totalorder %s2285_s12, %s2285_s12 }
  0x20   :  { %p2292_p0 = por %p2291_p13, %p2290_p12 }
  0x22   :  { %p2293_p1 = pnand %p2292_p0, %p2286_p11 }
  0x24   :  { %2296 = shalt.err (!%p2293_p1)
}
  0x25   :  { %s2507_s1 = smov 512   ;;  %s2508_s10 = smov 32  }
  0x26   :  { %65 = dma.hbm_to_vmem [thread:$0]  %s3377_s3, 8192, %s60_s24, [#allocation14], %s2507_s1, %s2507_s1, %s2508_s10  }
  0x27   :  { %s2509_s15 = smov [#allocation16]   ;;  %s2510_s17 = smov [#allocation7]  }
  0x28   :  { %s83_s16 = sshll.u32 %s2509_s15, 4  ;;  %s25_s18 = sshll.u32 %s2510_s17, 4  ;;  %s84_s16 = int_to_ptr.vmem [resolvable:$true] %s83_s16  ;;  %s2599_s18 = int_to_ptr.vmem [resolvable:$true] %s25_s18 }
  0x29   :  { %s2297_s21 = scalar_lea.hbm %s3379_s5, 2048 }
  0x2a   :  { %p2298_p2 = scmp.ne.s32.totalorder %s3379_s5, %s2297_s21  ;;  %p2301_p3 = scmp.lt.u32.totalorder %s2297_s21, %s3379_s5 }
  0x2c   :  { %p2303_p4 = pnand %p2301_p3, %p2298_p2 }
  0x2e   :  { %2306 = shalt.err (!%p2303_p4)
}
  0x2f   :  { %s2307_s3 = scalar_lea.vmem %s84_s16, 2048  ;;  %p2312_p6 = scmp.lt.s32.totalorder %s84_s16, %s84_s16 }
  0x30   :  { %p2308_p5 = scmp.ne.s32.totalorder %s84_s16, %s2307_s3  ;;  %p2313_p7 = scmp.lt.s32.totalorder %s2307_s3, %s2307_s3 }
  0x32   :  { %p2314_p8 = por %p2313_p7, %p2312_p6 }
  0x34   :  { %p2315_p9 = pnand %p2314_p8, %p2308_p5 }
  0x36   :  { %2318 = shalt.err (!%p2315_p9)
}
  0x37   :  { %s2511_s24 = smov 128   ;;  %s2512_s27 = smov 8  }
  0x38   :  { %89 = dma.hbm_to_vmem [thread:$0]  %s3379_s5, 2048, %s84_s16, [#allocation17], %s2511_s24, %s2511_s24, %s2512_s27  }
  0x39   :  { %s2319_s12 = scalar_lea.hbm %s3374_s0, 1024 }
  0x3a   :  { %p2320_p10 = scmp.ne.s32.totalorder %s3374_s0, %s2319_s12  ;;  %p2323_p11 = scmp.lt.u32.totalorder %s2319_s12, %s3374_s0 }
  0x3c   :  { %p2325_p12 = pnand %p2323_p11, %p2320_p10 }
  0x3e   :  { %2328 = shalt.err (!%p2325_p12)
}
  0x3f   :  { %s2329_s19 = scalar_lea.vmem %s2599_s18, 1024  ;;  %p2334_p0 = scmp.lt.s32.totalorder %s2599_s18, %s2599_s18 }
  0x40   :  { %p2330_p13 = scmp.ne.s32.totalorder %s2599_s18, %s2329_s19  ;;  %p2335_p1 = scmp.lt.s32.totalorder %s2329_s19, %s2329_s19 }
  0x42   :  { %p2336_p2 = por %p2335_p1, %p2334_p0 }
  0x44   :  { %p2337_p3 = pnand %p2336_p2, %p2330_p13 }
  0x46   :  { %2340 = shalt.err (!%p2337_p3)
}
  0x47   :  { %31 = dma.hbm_to_vmem [thread:$0]  %s3374_s0, 1024, %s2599_s18, [#allocation8], %s2511_s24, %s2511_s24, %s2512_s27  }
  0x48   :  { %s2513_s20 = smov [#allocation12]   ;;  %s2514_s22 = smov [#allocation15]  }
  0x49   :  { %s50_s21 = sshll.u32 %s2513_s20, 4  ;;  %s71_s23 = sshll.u32 %s2514_s22, 4  ;;  %s51_s21 = int_to_ptr.vmem [resolvable:$true] %s50_s21  ;;  %s2636_s23 = int_to_ptr.vmem [resolvable:$true] %s71_s23 }
  0x4a   :  { %s2341_s3 = scalar_lea.hbm %s3376_s2, 128 }
  0x4b   :  { %p2342_p4 = scmp.ne.s32.totalorder %s3376_s2, %s2341_s3  ;;  %p2345_p5 = scmp.lt.u32.totalorder %s2341_s3, %s3376_s2 }
  0x4d   :  { %p2347_p6 = pnand %p2345_p5, %p2342_p4 }
  0x4f   :  { %2350 = shalt.err (!%p2347_p6)
}
  0x50   :  { %s2351_s0 = scalar_lea.vmem %s51_s21, 128  ;;  %p2356_p8 = scmp.lt.s32.totalorder %s51_s21, %s51_s21 }
  0x51   :  { %p2352_p7 = scmp.ne.s32.totalorder %s51_s21, %s2351_s0  ;;  %p2357_p9 = scmp.lt.s32.totalorder %s2351_s0, %s2351_s0 }
  0x53   :  { %p2358_p10 = por %p2357_p9, %p2356_p8 }
  0x55   :  { %p2359_p11 = pnand %p2358_p10, %p2352_p7 }
  0x57   :  { %2362 = shalt.err (!%p2359_p11)
}
  0x58   :  { %53 = dma.hbm_to_vmem [thread:$0]  %s3376_s2, 128, %s51_s21, [#allocation11]  }
  0x59   :  { %s2363_s15 = scalar_lea.hbm %s3378_s4, 8192 }
  0x5a   :  { %p2364_p12 = scmp.ne.s32.totalorder %s3378_s4, %s2363_s15  ;;  %p2367_p13 = scmp.lt.u32.totalorder %s2363_s15, %s3378_s4 }
  0x5c   :  { %p2369_p0 = pnand %p2367_p13, %p2364_p12 }
  0x5e   :  { %2372 = shalt.err (!%p2369_p0)
}
  0x5f   :  { %s2373_s20 = scalar_lea.vmem %s2636_s23, 8192  ;;  %p2378_p2 = scmp.lt.s32.totalorder %s2636_s23, %s2636_s23 }
  0x60   :  { %p2374_p1 = scmp.ne.s32.totalorder %s2636_s23, %s2373_s20  ;;  %p2379_p3 = scmp.lt.s32.totalorder %s2373_s20, %s2373_s20 }
  0x62   :  { %p2380_p4 = por %p2379_p3, %p2378_p2 }
  0x64   :  { %p2381_p5 = pnand %p2380_p4, %p2374_p1 }
  0x66   :  { %2384 = shalt.err (!%p2381_p5)
}
  0x67   :  { %77 = dma.hbm_to_vmem [thread:$0]  %s3378_s4, 8192, %s2636_s23, [#allocation14], %s2507_s1, %s2507_s1, %s2508_s10  }
  0x68   :  { %s2515_s22 = smov [#allocation18]   ;;  %s2516_s26 = smov [#allocation19]  }
  0x69   :  { %s95_s25 = sshll.u32 %s2515_s22, 4  ;;  %s107_s3 = sshll.u32 %s2516_s26, 4  ;;  %s96_s25 = int_to_ptr.vmem [resolvable:$true] %s95_s25  ;;  %s2670_s3 = int_to_ptr.vmem [resolvable:$true] %s107_s3 }
  0x6a   :  { %s2385_s30 = scalar_lea.hbm %s3380_s6, 2048 }
  0x6b   :  { %p2386_p6 = scmp.ne.s32.totalorder %s3380_s6, %s2385_s30  ;;  %p2389_p7 = scmp.lt.u32.totalorder %s2385_s30, %s3380_s6 }
  0x6d   :  { %p2391_p8 = pnand %p2389_p7, %p2386_p6 }
  0x6f   :  { %2394 = shalt.err (!%p2391_p8)
}
  0x70   :  { %s2395_s4 = scalar_lea.vmem %s96_s25, 2048  ;;  %p2400_p10 = scmp.lt.s32.totalorder %s96_s25, %s96_s25 }
  0x71   :  { %p2396_p9 = scmp.ne.s32.totalorder %s96_s25, %s2395_s4  ;;  %p2401_p11 = scmp.lt.s32.totalorder %s2395_s4, %s2395_s4 }
  0x73   :  { %p2402_p12 = por %p2401_p11, %p2400_p10 }
  0x75   :  { %p2403_p13 = pnand %p2402_p12, %p2396_p9 }
  0x77   :  { %2406 = shalt.err (!%p2403_p13)
}
  0x78   :  { %101 = dma.hbm_to_vmem [thread:$0]  %s3380_s6, 2048, %s96_s25, [#allocation17], %s2511_s24, %s2511_s24, %s2512_s27  }
  0x79   :  { %s2407_s14 = scalar_lea.hbm %s3381_s7, 2048 }
  0x7a   :  { %p2408_p0 = scmp.ne.s32.totalorder %s3381_s7, %s2407_s14  ;;  %p2411_p1 = scmp.lt.u32.totalorder %s2407_s14, %s3381_s7 }
  0x7c   :  { %p2413_p2 = pnand %p2411_p1, %p2408_p0 }
  0x7e   :  { %2416 = shalt.err (!%p2413_p2)
}
  0x7f   :  { %s2417_s16 = scalar_lea.vmem %s2670_s3, 2048  ;;  %p2422_p4 = scmp.lt.s32.totalorder %s2670_s3, %s2670_s3 }
  0x80   :  { %p2418_p3 = scmp.ne.s32.totalorder %s2670_s3, %s2417_s16  ;;  %p2423_p5 = scmp.lt.s32.totalorder %s2417_s16, %s2417_s16 }
  0x82   :  { %p2424_p6 = por %p2423_p5, %p2422_p4 }
  0x84   :  { %p2425_p7 = pnand %p2424_p6, %p2418_p3 }
  0x86   :  { %2428 = shalt.err (!%p2425_p7)
}
  0x87   :  { %113 = dma.hbm_to_vmem [thread:$0]  %s3381_s7, 2048, %s2670_s3, [#allocation20], %s2511_s24, %s2511_s24, %s2512_s27  }
  0x88   :  { %2471 = dma.done.wait [#allocation8], 1024  }
  0x89   :  { %2472 = vsyncadd [#allocation8], 4294966272 }
  0x8a   :  { %2473 = dma.done.wait [#allocation11], 16512  }
  0x8b   :  { %2474 = vsyncadd [#allocation11], 4294950784 }
  0x8c   :  { %2475 = dma.done.wait [#allocation14], 16384  }
  0x8d   :  { %2476 = vsyncadd [#allocation14], 4294950912 }
  0x8e   :  { %2477 = dma.done.wait [#allocation17], 4096  }
  0x8f   :  { %2478 = vsyncadd [#allocation17], 4294963200 }
  0x90   :  { %2479 = dma.done.wait [#allocation20], 2048  }
  0x91   :  { %2480 = vsyncadd [#allocation20], 4294965248  ;;  %v3384_v0 = vmov 0.0   ;;  %v2711_v1 = vld [vmem:[#allocation13] sm:$0xff]  ;;  %v2713_v2 = vld [vmem:[#allocation13 + $0x8] sm:$0xff]  ;;  %s3161_s7 = smov 0  }
  0x92   :  { %141 = vst [vmem:[#allocation5] sm:$0xff] %v3384_v0  ;;  %142 = vst [vmem:[#allocation6] sm:$0xff] %v3384_v0  ;;  %403 = vmatprep.mubr.f32.mxu0 %v3384_v0  ;;  %516 = vmatprep.mubr.f32.mxu1 %v3384_v0  ;;  %v2715_v3 = vld [vmem:[#allocation13 + $0x10] sm:$0xff]  ;;  %v2717_v4 = vld [vmem:[#allocation13 + $0x18] sm:$0xff] }
  0x93   :  { %v2719_v5 = vld [vmem:[#allocation13 + $0x20] sm:$0xff]  ;;  %v2721_v6 = vld [vmem:[#allocation13 + $0x28] sm:$0xff]  ;;  %v2723_v7 = vld [vmem:[#allocation13 + $0x30] sm:$0xff] }
  0x94   :  { %v2725_v8 = vld [vmem:[#allocation13 + $0x38] sm:$0xff]  ;;  %v2727_v9 = vld [vmem:[#allocation13 + $0x40] sm:$0xff]  ;;  %v2729_v10 = vld [vmem:[#allocation13 + $0x48] sm:$0xff] }
  0x95   :  { %v2731_v11 = vld [vmem:[#allocation13 + $0x50] sm:$0xff]  ;;  %v2733_v12 = vld [vmem:[#allocation13 + $0x58] sm:$0xff]  ;;  %v2735_v13 = vld [vmem:[#allocation13 + $0x60] sm:$0xff] }
  0x96   :  { %v2737_v14 = vld [vmem:[#allocation13 + $0x68] sm:$0xff]  ;;  %v2739_v15 = vld [vmem:[#allocation13 + $0x70] sm:$0xff]  ;;  %v2741_v16 = vld [vmem:[#allocation13 + $0x78] sm:$0xff] }
  0x97   :  { %v2743_v17 = vld [vmem:[#allocation13 + $0x80] sm:$0xff]  ;;  %v2745_v18 = vld [vmem:[#allocation13 + $0x88] sm:$0xff]  ;;  %v2747_v19 = vld [vmem:[#allocation13 + $0x90] sm:$0xff] }
  0x98   :  { %v2749_v20 = vld [vmem:[#allocation13 + $0x98] sm:$0xff]  ;;  %v2751_v21 = vld [vmem:[#allocation13 + $0xa0] sm:$0xff]  ;;  %v2753_v22 = vld [vmem:[#allocation13 + $0xa8] sm:$0xff] }
  0x99   :  { %v2755_v23 = vld [vmem:[#allocation13 + $0xb0] sm:$0xff]  ;;  %v2757_v24 = vld [vmem:[#allocation13 + $0xb8] sm:$0xff]  ;;  %v2759_v25 = vld [vmem:[#allocation13 + $0xc0] sm:$0xff] }
  0x9a   :  { %3387 = vst [vmem:[#allocation28_spill] sm:$0xff] %v2759_v25  ;;  %v2761_v26 = vld [vmem:[#allocation13 + $0xc8] sm:$0xff]  ;;  %v2763_v27 = vld [vmem:[#allocation13 + $0xd0] sm:$0xff]  ;;  %v2765_v28 = vld [vmem:[#allocation13 + $0xd8] sm:$0xff] }
  0x9b   :  { %3388 = vst [vmem:[#allocation29_spill] sm:$0xff] %v2763_v27  ;;  %v2767_v29 = vld [vmem:[#allocation13 + $0xe0] sm:$0xff]  ;;  %v2769_v30 = vld [vmem:[#allocation13 + $0xe8] sm:$0xff]  ;;  %v2771_v31 = vld [vmem:[#allocation13 + $0xf0] sm:$0xff] }
  0x9c   :  { %3389 = vst [vmem:[#allocation30_spill] sm:$0xff] %v2767_v29  ;;  %3390 = vst [vmem:[#allocation31_spill] sm:$0xff] %v2771_v31  ;;  %v2773_v32 = vld [vmem:[#allocation13 + $0xf8] sm:$0xff]  ;;  %v2775_v33 = vld [vmem:[#allocation13 + $0x100] sm:$0xff] }
  0x9d   :  { %3391 = vst [vmem:[#allocation32_spill] sm:$0xff] %v2775_v33  ;;  %v2777_v34 = vld [vmem:[#allocation13 + $0x108] sm:$0xff]  ;;  %v2779_v35 = vld [vmem:[#allocation13 + $0x110] sm:$0xff]  ;;  %v2781_v36 = vld [vmem:[#allocation13 + $0x118] sm:$0xff] }
  0x9e   :  { %3392 = vst [vmem:[#allocation33_spill] sm:$0xff] %v2777_v34  ;;  %3393 = vst [vmem:[#allocation34_spill] sm:$0xff] %v2779_v35  ;;  %v2783_v37 = vld [vmem:[#allocation13 + $0x120] sm:$0xff]  ;;  %v2785_v38 = vld [vmem:[#allocation13 + $0x128] sm:$0xff] }
  0x9f   :  { %3394 = vst [vmem:[#allocation35_spill] sm:$0xff] %v2781_v36  ;;  %3395 = vst [vmem:[#allocation36_spill] sm:$0xff] %v2783_v37  ;;  %v2787_v39 = vld [vmem:[#allocation13 + $0x130] sm:$0xff]  ;;  %v2789_v40 = vld [vmem:[#allocation13 + $0x138] sm:$0xff] }
  0xa0   :  { %3396 = vst [vmem:[#allocation37_spill] sm:$0xff] %v2785_v38  ;;  %3397 = vst [vmem:[#allocation38_spill] sm:$0xff] %v2787_v39  ;;  %v2791_v41 = vld [vmem:[#allocation13 + $0x140] sm:$0xff]  ;;  %v2793_v42 = vld [vmem:[#allocation13 + $0x148] sm:$0xff] }
  0xa1   :  { %3398 = vst [vmem:[#allocation39_spill] sm:$0xff] %v2789_v40  ;;  %3399 = vst [vmem:[#allocation40_spill] sm:$0xff] %v2791_v41  ;;  %v2795_v43 = vld [vmem:[#allocation13 + $0x150] sm:$0xff]  ;;  %v2797_v44 = vld [vmem:[#allocation13 + $0x158] sm:$0xff] }
  0xa2   :  { %3400 = vst [vmem:[#allocation41_spill] sm:$0xff] %v2793_v42  ;;  %3401 = vst [vmem:[#allocation42_spill] sm:$0xff] %v2795_v43  ;;  %v2799_v45 = vld [vmem:[#allocation13 + $0x160] sm:$0xff]  ;;  %v2801_v46 = vld [vmem:[#allocation13 + $0x168] sm:$0xff] }
  0xa3   :  { %3402 = vst [vmem:[#allocation43_spill] sm:$0xff] %v2797_v44  ;;  %3403 = vst [vmem:[#allocation44_spill] sm:$0xff] %v2799_v45  ;;  %v2803_v47 = vld [vmem:[#allocation13 + $0x170] sm:$0xff]  ;;  %v2805_v48 = vld [vmem:[#allocation13 + $0x178] sm:$0xff] }
  0xa4   :  { %3404 = vst [vmem:[#allocation45_spill] sm:$0xff] %v2801_v46  ;;  %3405 = vst [vmem:[#allocation46_spill] sm:$0xff] %v2803_v47  ;;  %v2807_v49 = vld [vmem:[#allocation13 + $0x180] sm:$0xff]  ;;  %v2809_v50 = vld [vmem:[#allocation13 + $0x188] sm:$0xff] }
  0xa5   :  { %3406 = vst [vmem:[#allocation47_spill] sm:$0xff] %v2805_v48  ;;  %3407 = vst [vmem:[#allocation48_spill] sm:$0xff] %v2807_v49  ;;  %v2811_v51 = vld [vmem:[#allocation13 + $0x190] sm:$0xff]  ;;  %v2813_v52 = vld [vmem:[#allocation13 + $0x198] sm:$0xff] }
  0xa6   :  { %3408 = vst [vmem:[#allocation49_spill] sm:$0xff] %v2809_v50  ;;  %3409 = vst [vmem:[#allocation50_spill] sm:$0xff] %v2811_v51  ;;  %v2815_v53 = vld [vmem:[#allocation13 + $0x1a0] sm:$0xff]  ;;  %v2817_v54 = vld [vmem:[#allocation13 + $0x1a8] sm:$0xff] }
  0xa7   :  { %3410 = vst [vmem:[#allocation51_spill] sm:$0xff] %v2813_v52  ;;  %3411 = vst [vmem:[#allocation52_spill] sm:$0xff] %v2815_v53  ;;  %v2819_v55 = vld [vmem:[#allocation13 + $0x1b0] sm:$0xff]  ;;  %v2821_v56 = vld [vmem:[#allocation13 + $0x1b8] sm:$0xff] }
  0xa8   :  { %3412 = vst [vmem:[#allocation53_spill] sm:$0xff] %v2817_v54  ;;  %3413 = vst [vmem:[#allocation54_spill] sm:$0xff] %v2819_v55  ;;  %v2823_v57 = vld [vmem:[#allocation13 + $0x1c0] sm:$0xff]  ;;  %v2825_v58 = vld [vmem:[#allocation13 + $0x1c8] sm:$0xff] }
  0xa9   :  { %3414 = vst [vmem:[#allocation55_spill] sm:$0xff] %v2821_v56  ;;  %3415 = vst [vmem:[#allocation56_spill] sm:$0xff] %v2823_v57  ;;  %v2827_v59 = vld [vmem:[#allocation13 + $0x1d0] sm:$0xff]  ;;  %v2829_v60 = vld [vmem:[#allocation13 + $0x1d8] sm:$0xff] }
  0xaa   :  { %3416 = vst [vmem:[#allocation57_spill] sm:$0xff] %v2825_v58  ;;  %3417 = vst [vmem:[#allocation58_spill] sm:$0xff] %v2827_v59  ;;  %v2831_v61 = vld [vmem:[#allocation13 + $0x1e0] sm:$0xff]  ;;  %v2833_v62 = vld [vmem:[#allocation13 + $0x1e8] sm:$0xff] }
  0xab   :  { %3418 = vst [vmem:[#allocation59_spill] sm:$0xff] %v2829_v60  ;;  %3419 = vst [vmem:[#allocation60_spill] sm:$0xff] %v2831_v61  ;;  %v2835_v63 = vld [vmem:[#allocation13 + $0x1f0] sm:$0xff]  ;;  %v2837_v0 = vld [vmem:[#allocation13 + $0x1f8] sm:$0xff] }
  0xac   :  { %3420 = vst [vmem:[#allocation61_spill] sm:$0xff] %v2833_v62  ;;  %3421 = vst [vmem:[#allocation62_spill] sm:$0xff] %v2835_v63  ;;  %v2839_v51 = vld [vmem:[#allocation15] sm:$0xff]  ;;  %v2841_v55 = vld [vmem:[#allocation15 + $0x8] sm:$0xff] }
  0xad   :  { %3422 = vst [vmem:[#allocation63_spill] sm:$0xff] %v2837_v0  ;;  %3423 = vst [vmem:[#allocation64_spill] sm:$0xff] %v2839_v51  ;;  %v2843_v53 = vld [vmem:[#allocation15 + $0x10] sm:$0xff]  ;;  %v2845_v57 = vld [vmem:[#allocation15 + $0x18] sm:$0xff] }
  0xae   :  { %3424 = vst [vmem:[#allocation65_spill] sm:$0xff] %v2841_v55  ;;  %3425 = vst [vmem:[#allocation66_spill] sm:$0xff] %v2843_v53  ;;  %v2847_v58 = vld [vmem:[#allocation15 + $0x20] sm:$0xff]  ;;  %v2849_v59 = vld [vmem:[#allocation15 + $0x28] sm:$0xff] }
  0xaf   :  { %3426 = vst [vmem:[#allocation67_spill] sm:$0xff] %v2845_v57  ;;  %3427 = vst [vmem:[#allocation68_spill] sm:$0xff] %v2847_v58  ;;  %v2851_v60 = vld [vmem:[#allocation15 + $0x30] sm:$0xff]  ;;  %v2853_v61 = vld [vmem:[#allocation15 + $0x38] sm:$0xff] }
  0xb0   :  { %3428 = vst [vmem:[#allocation69_spill] sm:$0xff] %v2849_v59  ;;  %3429 = vst [vmem:[#allocation70_spill] sm:$0xff] %v2851_v60  ;;  %v2855_v62 = vld [vmem:[#allocation15 + $0x40] sm:$0xff]  ;;  %v2857_v63 = vld [vmem:[#allocation15 + $0x48] sm:$0xff] }
  0xb1   :  { %3430 = vst [vmem:[#allocation71_spill] sm:$0xff] %v2853_v61  ;;  %3431 = vst [vmem:[#allocation72_spill] sm:$0xff] %v2855_v62  ;;  %v2859_v0 = vld [vmem:[#allocation15 + $0x50] sm:$0xff]  ;;  %v2861_v51 = vld [vmem:[#allocation15 + $0x58] sm:$0xff] }
  0xb2   :  { %3432 = vst [vmem:[#allocation73_spill] sm:$0xff] %v2857_v63  ;;  %3433 = vst [vmem:[#allocation74_spill] sm:$0xff] %v2859_v0  ;;  %v2863_v55 = vld [vmem:[#allocation15 + $0x60] sm:$0xff]  ;;  %v2865_v53 = vld [vmem:[#allocation15 + $0x68] sm:$0xff] }
  0xb3   :  { %3434 = vst [vmem:[#allocation75_spill] sm:$0xff] %v2861_v51  ;;  %3435 = vst [vmem:[#allocation76_spill] sm:$0xff] %v2863_v55  ;;  %v2867_v57 = vld [vmem:[#allocation15 + $0x70] sm:$0xff]  ;;  %v2869_v58 = vld [vmem:[#allocation15 + $0x78] sm:$0xff] }
  0xb4   :  { %3436 = vst [vmem:[#allocation77_spill] sm:$0xff] %v2865_v53  ;;  %3437 = vst [vmem:[#allocation78_spill] sm:$0xff] %v2867_v57  ;;  %v2871_v59 = vld [vmem:[#allocation15 + $0x80] sm:$0xff]  ;;  %v2873_v60 = vld [vmem:[#allocation15 + $0x88] sm:$0xff] }
  0xb5   :  { %3438 = vst [vmem:[#allocation79_spill] sm:$0xff] %v2869_v58  ;;  %3439 = vst [vmem:[#allocation80_spill] sm:$0xff] %v2871_v59  ;;  %v2875_v61 = vld [vmem:[#allocation15 + $0x90] sm:$0xff]  ;;  %v2877_v62 = vld [vmem:[#allocation15 + $0x98] sm:$0xff] }
  0xb6   :  { %3440 = vst [vmem:[#allocation81_spill] sm:$0xff] %v2873_v60  ;;  %3441 = vst [vmem:[#allocation82_spill] sm:$0xff] %v2875_v61  ;;  %v2879_v63 = vld [vmem:[#allocation15 + $0xa0] sm:$0xff]  ;;  %v2881_v0 = vld [vmem:[#allocation15 + $0xa8] sm:$0xff] }
  0xb7   :  { %3442 = vst [vmem:[#allocation83_spill] sm:$0xff] %v2877_v62  ;;  %3443 = vst [vmem:[#allocation84_spill] sm:$0xff] %v2879_v63  ;;  %v2883_v51 = vld [vmem:[#allocation15 + $0xb0] sm:$0xff]  ;;  %v2885_v55 = vld [vmem:[#allocation15 + $0xb8] sm:$0xff] }
  0xb8   :  { %3444 = vst [vmem:[#allocation85_spill] sm:$0xff] %v2881_v0  ;;  %3445 = vst [vmem:[#allocation86_spill] sm:$0xff] %v2883_v51  ;;  %v2887_v53 = vld [vmem:[#allocation15 + $0xc0] sm:$0xff]  ;;  %v2889_v57 = vld [vmem:[#allocation15 + $0xc8] sm:$0xff] }
  0xb9   :  { %3446 = vst [vmem:[#allocation87_spill] sm:$0xff] %v2885_v55  ;;  %3447 = vst [vmem:[#allocation88_spill] sm:$0xff] %v2887_v53  ;;  %v2891_v58 = vld [vmem:[#allocation15 + $0xd0] sm:$0xff]  ;;  %v2893_v59 = vld [vmem:[#allocation15 + $0xd8] sm:$0xff] }
  0xba   :  { %3448 = vst [vmem:[#allocation89_spill] sm:$0xff] %v2889_v57  ;;  %3449 = vst [vmem:[#allocation90_spill] sm:$0xff] %v2891_v58  ;;  %v2895_v60 = vld [vmem:[#allocation15 + $0xe0] sm:$0xff]  ;;  %v2897_v61 = vld [vmem:[#allocation15 + $0xe8] sm:$0xff] }
  0xbb   :  { %3450 = vst [vmem:[#allocation91_spill] sm:$0xff] %v2893_v59  ;;  %3451 = vst [vmem:[#allocation92_spill] sm:$0xff] %v2895_v60  ;;  %v2899_v62 = vld [vmem:[#allocation15 + $0xf0] sm:$0xff]  ;;  %v2901_v63 = vld [vmem:[#allocation15 + $0xf8] sm:$0xff] }
  0xbc   :  { %3452 = vst [vmem:[#allocation93_spill] sm:$0xff] %v2897_v61  ;;  %3453 = vst [vmem:[#allocation94_spill] sm:$0xff] %v2899_v62  ;;  %v2903_v0 = vld [vmem:[#allocation15 + $0x100] sm:$0xff]  ;;  %v2905_v51 = vld [vmem:[#allocation15 + $0x108] sm:$0xff] }
  0xbd   :  { %3454 = vst [vmem:[#allocation95_spill] sm:$0xff] %v2901_v63  ;;  %3455 = vst [vmem:[#allocation96_spill] sm:$0xff] %v2903_v0  ;;  %v2907_v55 = vld [vmem:[#allocation15 + $0x110] sm:$0xff]  ;;  %v2909_v53 = vld [vmem:[#allocation15 + $0x118] sm:$0xff] }
  0xbe   :  { %3456 = vst [vmem:[#allocation97_spill] sm:$0xff] %v2905_v51  ;;  %3457 = vst [vmem:[#allocation98_spill] sm:$0xff] %v2907_v55  ;;  %v2911_v57 = vld [vmem:[#allocation15 + $0x120] sm:$0xff]  ;;  %v2913_v58 = vld [vmem:[#allocation15 + $0x128] sm:$0xff] }
  0xbf   :  { %3458 = vst [vmem:[#allocation99_spill] sm:$0xff] %v2909_v53  ;;  %3459 = vst [vmem:[#allocation100_spill] sm:$0xff] %v2911_v57  ;;  %v2915_v59 = vld [vmem:[#allocation15 + $0x130] sm:$0xff]  ;;  %v2917_v60 = vld [vmem:[#allocation15 + $0x138] sm:$0xff] }
  0xc0   :  { %3460 = vst [vmem:[#allocation101_spill] sm:$0xff] %v2913_v58  ;;  %3461 = vst [vmem:[#allocation102_spill] sm:$0xff] %v2915_v59  ;;  %v2919_v61 = vld [vmem:[#allocation15 + $0x140] sm:$0xff]  ;;  %v2921_v62 = vld [vmem:[#allocation15 + $0x148] sm:$0xff] }
  0xc1   :  { %3462 = vst [vmem:[#allocation103_spill] sm:$0xff] %v2917_v60  ;;  %3463 = vst [vmem:[#allocation104_spill] sm:$0xff] %v2919_v61  ;;  %v2923_v63 = vld [vmem:[#allocation15 + $0x150] sm:$0xff]  ;;  %v2925_v0 = vld [vmem:[#allocation15 + $0x158] sm:$0xff] }
  0xc2   :  { %3464 = vst [vmem:[#allocation105_spill] sm:$0xff] %v2921_v62  ;;  %3465 = vst [vmem:[#allocation106_spill] sm:$0xff] %v2923_v63  ;;  %v2927_v51 = vld [vmem:[#allocation15 + $0x160] sm:$0xff]  ;;  %v2929_v55 = vld [vmem:[#allocation15 + $0x168] sm:$0xff] }
  0xc3   :  { %3466 = vst [vmem:[#allocation107_spill] sm:$0xff] %v2925_v0  ;;  %3467 = vst [vmem:[#allocation108_spill] sm:$0xff] %v2927_v51  ;;  %v2931_v53 = vld [vmem:[#allocation15 + $0x170] sm:$0xff]  ;;  %v2933_v57 = vld [vmem:[#allocation15 + $0x178] sm:$0xff] }
  0xc4   :  { %3468 = vst [vmem:[#allocation109_spill] sm:$0xff] %v2929_v55  ;;  %3469 = vst [vmem:[#allocation110_spill] sm:$0xff] %v2931_v53  ;;  %v2935_v58 = vld [vmem:[#allocation15 + $0x180] sm:$0xff]  ;;  %v2937_v59 = vld [vmem:[#allocation15 + $0x188] sm:$0xff] }
  0xc5   :  { %3470 = vst [vmem:[#allocation111_spill] sm:$0xff] %v2933_v57  ;;  %3471 = vst [vmem:[#allocation112_spill] sm:$0xff] %v2935_v58  ;;  %v2939_v60 = vld [vmem:[#allocation15 + $0x190] sm:$0xff]  ;;  %v2941_v61 = vld [vmem:[#allocation15 + $0x198] sm:$0xff] }
  0xc6   :  { %3472 = vst [vmem:[#allocation113_spill] sm:$0xff] %v2937_v59  ;;  %3473 = vst [vmem:[#allocation114_spill] sm:$0xff] %v2939_v60  ;;  %v2943_v62 = vld [vmem:[#allocation15 + $0x1a0] sm:$0xff]  ;;  %v2945_v63 = vld [vmem:[#allocation15 + $0x1a8] sm:$0xff] }
  0xc7   :  { %3474 = vst [vmem:[#allocation115_spill] sm:$0xff] %v2941_v61  ;;  %3475 = vst [vmem:[#allocation116_spill] sm:$0xff] %v2943_v62  ;;  %v2947_v0 = vld [vmem:[#allocation15 + $0x1b0] sm:$0xff]  ;;  %v2949_v51 = vld [vmem:[#allocation15 + $0x1b8] sm:$0xff] }
  0xc8   :  { %3476 = vst [vmem:[#allocation117_spill] sm:$0xff] %v2945_v63  ;;  %3477 = vst [vmem:[#allocation118_spill] sm:$0xff] %v2947_v0  ;;  %v2951_v55 = vld [vmem:[#allocation15 + $0x1c0] sm:$0xff]  ;;  %v2953_v53 = vld [vmem:[#allocation15 + $0x1c8] sm:$0xff] }
  0xc9   :  { %3478 = vst [vmem:[#allocation119_spill] sm:$0xff] %v2949_v51  ;;  %3479 = vst [vmem:[#allocation120_spill] sm:$0xff] %v2951_v55  ;;  %v2955_v57 = vld [vmem:[#allocation15 + $0x1d0] sm:$0xff]  ;;  %v2957_v58 = vld [vmem:[#allocation15 + $0x1d8] sm:$0xff] }
  0xca   :  { %3480 = vst [vmem:[#allocation121_spill] sm:$0xff] %v2953_v53  ;;  %3481 = vst [vmem:[#allocation122_spill] sm:$0xff] %v2955_v57  ;;  %v2959_v59 = vld [vmem:[#allocation15 + $0x1e0] sm:$0xff]  ;;  %v2961_v60 = vld [vmem:[#allocation15 + $0x1e8] sm:$0xff] }
  0xcb   :  { %3482 = vst [vmem:[#allocation123_spill] sm:$0xff] %v2957_v58  ;;  %3483 = vst [vmem:[#allocation124_spill] sm:$0xff] %v2959_v59  ;;  %v2963_v61 = vld [vmem:[#allocation15 + $0x1f0] sm:$0xff]  ;;  %v2965_v62 = vld [vmem:[#allocation15 + $0x1f8] sm:$0xff] }
  0xcc   :  { %3484 = vst [vmem:[#allocation125_spill] sm:$0xff] %v2961_v60  ;;  %3485 = vst [vmem:[#allocation126_spill] sm:$0xff] %v2963_v61  ;;  %v144_v63 = vld [vmem:[#allocation10 + $0x8] sm:$0xff]  ;;  %v146_v49 = vld [vmem:[#allocation10 + $0x18] sm:$0xff] }
  0xcd   :  { %3486 = vst [vmem:[#allocation127_spill] sm:$0xff] %v2965_v62  ;;  %v152_v0 = vld [vmem:[#allocation10 + $0x48] sm:$0xff]  ;;  %v154_v51 = vld [vmem:[#allocation10 + $0x58] sm:$0xff]  ;;  %v143_v52 = vld [vmem:[#allocation10] sm:$0xff] }
  0xce   :  { %v1834_v56 = vpack.c.bf16 %v152_v0, %v144_v63  ;;  %v1866_v55 = vpack.c.bf16 %v154_v51, %v146_v49  ;;  %v151_v53 = vld [vmem:[#allocation10 + $0x40] sm:$0xff]  ;;  %v145_v47 = vld [vmem:[#allocation10 + $0x10] sm:$0xff]  ;;  %v160_v58 = vld [vmem:[#allocation10 + $0x88] sm:$0xff] }
  0xcf   :  { %v1836_v57 = vpack.c.bf16 %v151_v53, %v143_v52  ;;  %v153_v43 = vld [vmem:[#allocation10 + $0x50] sm:$0xff]  ;;  %v168_v54 = vld [vmem:[#allocation10 + $0xc8] sm:$0xff]  ;;  %v162_v61 = vld [vmem:[#allocation10 + $0x98] sm:$0xff] }
  0xd0   :  { %1835 = vmatprep.subr.bf16.mxu0 %v1834_v56  ;;  %1867 = vmatprep.subr.bf16.mxu1 %v1866_v55  ;;  %v1868_v59 = vpack.c.bf16 %v153_v43, %v145_v47  ;;  %v1838_v60 = vpack.c.bf16 %v168_v54, %v160_v58  ;;  %v170_v50 = vld [vmem:[#allocation10 + $0xd8] sm:$0xff]  ;;  %v159_v62 = vld [vmem:[#allocation10 + $0x80] sm:$0xff]  ;;  %v161_v48 = vld [vmem:[#allocation10 + $0x90] sm:$0xff] }
  0xd1   :  { %1837 = vmatpush1.bf16.msra.mxu0 %v1836_v57  ;;  %v1870_v45 = vpack.c.bf16 %v170_v50, %v162_v61  ;;  %v167_v41 = vld [vmem:[#allocation10 + $0xc0] sm:$0xff]  ;;  %v169_v0 = vld [vmem:[#allocation10 + $0xd0] sm:$0xff]  ;;  %v176_v52 = vld [vmem:[#allocation10 + $0x108] sm:$0xff] }
  0xd2   :  { %1869 = vmatpush1.bf16.msra.mxu1 %v1868_v59  ;;  %1839 = vmatprep.subr.bf16.mxu0 %v1838_v60  ;;  %v1840_v49 = vpack.c.bf16 %v167_v41, %v159_v62  ;;  %v1872_v51 = vpack.c.bf16 %v169_v0, %v161_v48  ;;  %v184_v53 = vld [vmem:[#allocation10 + $0x148] sm:$0xff]  ;;  %v178_v63 = vld [vmem:[#allocation10 + $0x118] sm:$0xff]  ;;  %v175_v43 = vld [vmem:[#allocation10 + $0x100] sm:$0xff] }
  0xd3   :  { %1871 = vmatprep.subr.bf16.mxu1 %v1870_v45  ;;  %v1842_v56 = vpack.c.bf16 %v184_v53, %v176_v52  ;;  %v186_v55 = vld [vmem:[#allocation10 + $0x158] sm:$0xff]  ;;  %v183_v47 = vld [vmem:[#allocation10 + $0x140] sm:$0xff]  ;;  %v177_v58 = vld [vmem:[#allocation10 + $0x110] sm:$0xff] }
  0xd4   :  { %v1874_v54 = vpack.c.bf16 %v186_v55, %v178_v63  ;;  %v185_v44 = vld [vmem:[#allocation10 + $0x150] sm:$0xff]  ;;  %v192_v57 = vld [vmem:[#allocation10 + $0x188] sm:$0xff]  ;;  %v1844_v50 = vpack.c.bf16 %v183_v47, %v175_v43  ;;  %v194_v39 = vld [vmem:[#allocation10 + $0x198] sm:$0xff] }
  0xd5   :  { %1841 = vmatpush1.bf16.msra.mxu0 %v1840_v49  ;;  %v200_v61 = vld [vmem:[#allocation10 + $0x1c8] sm:$0xff]  ;;  %v202_v59 = vld [vmem:[#allocation10 + $0x1d8] sm:$0xff]  ;;  %v1876_v41 = vpack.c.bf16 %v185_v44, %v177_v58  ;;  %v191_v60 = vld [vmem:[#allocation10 + $0x180] sm:$0xff] }
  0xd6   :  { %1873 = vmatpush1.bf16.msra.mxu1 %v1872_v51  ;;  %1843 = vmatprep.subr.bf16.mxu0 %v1842_v56  ;;  %v1846_v48 = vpack.c.bf16 %v200_v61, %v192_v57  ;;  %v199_v62 = vld [vmem:[#allocation10 + $0x1c0] sm:$0xff]  ;;  %v193_v45 = vld [vmem:[#allocation10 + $0x190] sm:$0xff]  ;;  %v1878_v0 = vpack.c.bf16 %v202_v59, %v194_v39  ;;  %v208_v53 = vld [vmem:[#allocation10 + $0x208] sm:$0xff] }
  0xd7   :  { %1875 = vmatprep.subr.bf16.mxu1 %v1874_v54  ;;  %v201_v52 = vld [vmem:[#allocation10 + $0x1d0] sm:$0xff]  ;;  %v216_v63 = vld [vmem:[#allocation10 + $0x248] sm:$0xff]  ;;  %v210_v55 = vld [vmem:[#allocation10 + $0x218] sm:$0xff]  ;;  %v1848_v49 = vpack.c.bf16 %v199_v62, %v191_v60 }
  0xd8   :  { %v218_v35 = vld [vmem:[#allocation10 + $0x258] sm:$0xff]  ;;  %v1880_v43 = vpack.c.bf16 %v201_v52, %v193_v45  ;;  %v1850_v47 = vpack.c.bf16 %v216_v63, %v208_v53  ;;  %v207_v51 = vld [vmem:[#allocation10 + $0x200] sm:$0xff]  ;;  %v209_v44 = vld [vmem:[#allocation10 + $0x210] sm:$0xff] }
  0xd9   :  { %1845 = vmatpush1.bf16.msra.mxu0 %v1844_v50  ;;  %v215_v56 = vld [vmem:[#allocation10 + $0x240] sm:$0xff]  ;;  %v1882_v58 = vpack.c.bf16 %v218_v35, %v210_v55  ;;  %v217_v57 = vld [vmem:[#allocation10 + $0x250] sm:$0xff]  ;;  %v224_v61 = vld [vmem:[#allocation10 + $0x288] sm:$0xff] }
  0xda   :  { %1877 = vmatpush1.bf16.msra.mxu1 %v1876_v41  ;;  %1847 = vmatprep.subr.bf16.mxu0 %v1846_v48  ;;  %v232_v54 = vld [vmem:[#allocation10 + $0x2c8] sm:$0xff]  ;;  %v226_v39 = vld [vmem:[#allocation10 + $0x298] sm:$0xff]  ;;  %v1852_v46 = vpack.c.bf16 %v215_v56, %v207_v51  ;;  %v1884_v50 = vpack.c.bf16 %v217_v57, %v209_v44  ;;  %v223_v41 = vld [vmem:[#allocation10 + $0x280] sm:$0xff] }
  0xdb   :  { %1879 = vmatprep.subr.bf16.mxu1 %v1878_v0  ;;  %v234_v59 = vld [vmem:[#allocation10 + $0x2d8] sm:$0xff]  ;;  %v1854_v60 = vpack.c.bf16 %v232_v54, %v224_v61  ;;  %v231_v48 = vld [vmem:[#allocation10 + $0x2c0] sm:$0xff]  ;;  %v225_v62 = vld [vmem:[#allocation10 + $0x290] sm:$0xff] }
  0xdc   :  { %v1886_v45 = vpack.c.bf16 %v234_v59, %v226_v39  ;;  %v233_v52 = vld [vmem:[#allocation10 + $0x2d0] sm:$0xff]  ;;  %v240_v53 = vld [vmem:[#allocation10 + $0x308] sm:$0xff]  ;;  %v242_v35 = vld [vmem:[#allocation10 + $0x318] sm:$0xff]  ;;  %v1856_v55 = vpack.c.bf16 %v231_v48, %v223_v41 }
  0xdd   :  { %1849 = vmatpush1.bf16.msra.mxu0 %v1848_v49  ;;  %v248_v0 = vld [vmem:[#allocation10 + $0x348] sm:$0xff]  ;;  %v250_v63 = vld [vmem:[#allocation10 + $0x358] sm:$0xff]  ;;  %v1888_v49 = vpack.c.bf16 %v233_v52, %v225_v62  ;;  %v241_v56 = vld [vmem:[#allocation10 + $0x310] sm:$0xff] }
  0xde   :  { %1881 = vmatpush1.bf16.msra.mxu1 %v1880_v43  ;;  %1851 = vmatprep.subr.bf16.mxu0 %v1850_v47  ;;  %v1858_v51 = vpack.c.bf16 %v248_v0, %v240_v53  ;;  %v239_v43 = vld [vmem:[#allocation10 + $0x300] sm:$0xff]  ;;  %v1890_v44 = vpack.c.bf16 %v250_v63, %v242_v35  ;;  %v249_v57 = vld [vmem:[#allocation10 + $0x350] sm:$0xff]  ;;  %v256_v61 = vld [vmem:[#allocation10 + $0x388] sm:$0xff] }
  0xdf   :  { %1883 = vmatprep.subr.bf16.mxu1 %v1882_v58  ;;  %v247_v47 = vld [vmem:[#allocation10 + $0x340] sm:$0xff]  ;;  %v264_v58 = vld [vmem:[#allocation10 + $0x3c8] sm:$0xff]  ;;  %v258_v54 = vld [vmem:[#allocation10 + $0x398] sm:$0xff] }
  0xe0   :  { %v266_v39 = vld [vmem:[#allocation10 + $0x3d8] sm:$0xff]  ;;  %v1860_v59 = vpack.c.bf16 %v247_v47, %v239_v43  ;;  %v1862_v41 = vpack.c.bf16 %v264_v58, %v256_v61  ;;  %v257_v48 = vld [vmem:[#allocation10 + $0x390] sm:$0xff]  ;;  %v148_v53 = vld [vmem:[#allocation10 + $0x28] sm:$0xff] }
  0xe1   :  { %1853 = vmatpush1.bf16.msra.mxu0 %v1852_v46  ;;  %v1892_v46 = vpack.c.bf16 %v249_v57, %v241_v56  ;;  %v1894_v62 = vpack.c.bf16 %v266_v39, %v258_v54  ;;  %v265_v52 = vld [vmem:[#allocation10 + $0x3d0] sm:$0xff]  ;;  %v150_v0 = vld [vmem:[#allocation10 + $0x38] sm:$0xff]  ;;  %v164_v61 = vld [vmem:[#allocation10 + $0xa8] sm:$0xff] }
  0xe2   :  { %1885 = vmatpush1.bf16.msra.mxu1 %v1884_v50  ;;  %1855 = vmatprep.subr.bf16.mxu0 %v1854_v60  ;;  %v255_v50 = vld [vmem:[#allocation10 + $0x380] sm:$0xff]  ;;  %v158_v35 = vld [vmem:[#allocation10 + $0x78] sm:$0xff]  ;;  %v149_v56 = vld [vmem:[#allocation10 + $0x30] sm:$0xff] }
  0xe3   :  { %1887 = vmatprep.subr.bf16.mxu1 %v1886_v45  ;;  %v263_v60 = vld [vmem:[#allocation10 + $0x3c0] sm:$0xff]  ;;  %v156_v45 = vld [vmem:[#allocation10 + $0x68] sm:$0xff]  ;;  %v1930_v47 = vpack.c.bf16 %v158_v35, %v150_v0  ;;  %v157_v57 = vld [vmem:[#allocation10 + $0x70] sm:$0xff] }
  0xe4   :  { %v1864_v63 = vpack.c.bf16 %v263_v60, %v255_v50  ;;  %v1898_v43 = vpack.c.bf16 %v156_v45, %v148_v53  ;;  %v2967_v58 = vld [vmem:[#allocation7] sm:$0xff]  ;;  %v166_v39 = vld [vmem:[#allocation10 + $0xb8] sm:$0xff]  ;;  %v2969_v50 = vld [vmem:[#allocation7 + $0x8] sm:$0xff] }
  0xe5   :  { %1857 = vmatpush1.bf16.msra.mxu0 %v1856_v55  ;;  %v1896_v55 = vpack.c.bf16 %v265_v52, %v257_v48  ;;  %v174_v42 = vld [vmem:[#allocation10 + $0xf8] sm:$0xff]  ;;  %v165_v48 = vld [vmem:[#allocation10 + $0xb0] sm:$0xff]  ;;  %v180_v53 = vld [vmem:[#allocation10 + $0x128] sm:$0xff]  ;;  %v281_v35 = vmax.f32 %v2967_v58, 0.0 }
  0xe6   :  { %1889 = vmatpush1.bf16.msra.mxu1 %v1888_v49  ;;  %1859 = vmatprep.subr.bf16.mxu0 %v1858_v51  ;;  %v147_v49 = vld [vmem:[#allocation10 + $0x20] sm:$0xff]  ;;  %v1934_v52 = vpack.c.bf16 %v174_v42, %v166_v39  ;;  %v188_v45 = vld [vmem:[#allocation10 + $0x168] sm:$0xff]  ;;  %v182_v0 = vld [vmem:[#allocation10 + $0x138] sm:$0xff] }
  0xe7   :  { %1891 = vmatprep.subr.bf16.mxu1 %v1890_v44  ;;  %v155_v51 = vld [vmem:[#allocation10 + $0x60] sm:$0xff]  ;;  %v172_v44 = vld [vmem:[#allocation10 + $0xe8] sm:$0xff]  ;;  %v1906_v39 = vpack.c.bf16 %v188_v45, %v180_v53  ;;  %v2987_v33 = vld [vmem:[#allocation7 + $0x30] sm:$0xff] }
  0xe8   :  { %v1900_v54 = vpack.c.bf16 %v155_v51, %v147_v49  ;;  %v1902_v60 = vpack.c.bf16 %v172_v44, %v164_v61  ;;  %v2976_v49 = vld [vmem:[#allocation7 + $0x28] sm:$0xff]  ;;  %v3487_v51 = vmov 0.0   ;;  %v198_v36 = vld [vmem:[#allocation10 + $0x1b8] sm:$0xff]  ;;  %v287_v45 = vmax.f32 %v2987_v33, 0.0  ;;  %v203_v31 = vld [vmem:[#allocation10 + $0x1e0] sm:$0xff] }
  0xe9   :  { %1861 = vmatpush1.bf16.msra.mxu0 %v1860_v59  ;;  %v1932_v59 = vpack.c.bf16 %v157_v57, %v149_v56  ;;  %v179_v56 = vld [vmem:[#allocation10 + $0x120] sm:$0xff]  ;;  %v286_v44 = vmax.f32 %v2976_v49, 0.0  ;;  %v204_v37 = vld [vmem:[#allocation10 + $0x1e8] sm:$0xff]  ;;  %v206_v53 = vld [vmem:[#allocation10 + $0x1f8] sm:$0xff] }
  0xea   :  { %1893 = vmatpush1.bf16.msra.mxu1 %v1892_v46  ;;  %1863 = vmatprep.subr.bf16.mxu0 %v1862_v41  ;;  %v163_v46 = vld [vmem:[#allocation10 + $0xa0] sm:$0xff]  ;;  %v2996_v34 = vld [vmem:[#allocation7 + $0x38] sm:$0xff]  ;;  %v212_v29 = vld [vmem:[#allocation10 + $0x228] sm:$0xff] }
  0xeb   :  { %1895 = vmatprep.subr.bf16.mxu1 %v1894_v62  ;;  %v171_v41 = vld [vmem:[#allocation10 + $0xe0] sm:$0xff]  ;;  %v173_v62 = vld [vmem:[#allocation10 + $0xf0] sm:$0xff]  ;;  %v288_v25 = vmax.f32 %v2996_v34, 0.0 }
  0xec   :  { %v1936_v42 = vpack.c.bf16 %v173_v62, %v165_v48  ;;  %v187_v57 = vld [vmem:[#allocation10 + $0x160] sm:$0xff]  ;;  %v196_v62 = vld [vmem:[#allocation10 + $0x1a8] sm:$0xff] }
  0xed   :  { %1865 = vmatpush1.bf16.msra.mxu0 %v1864_v63  ;;  %v1904_v63 = vpack.c.bf16 %v171_v41, %v163_v46  ;;  %v181_v46 = vld [vmem:[#allocation10 + $0x130] sm:$0xff]  ;;  %v1908_v40 = vpack.c.bf16 %v187_v57, %v179_v56 }
  0xee   :  { %1897 = vmatpush1.bf16.msra.mxu1 %v1896_v55  ;;  %1899 = vmatprep.subr.bf16.mxu0 %v1898_v43  ;;  %v190_v55 = vld [vmem:[#allocation10 + $0x178] sm:$0xff]  ;;  %v2974_v43 = vld [vmem:[#allocation7 + $0x20] sm:$0xff]  ;;  %v189_v41 = vld [vmem:[#allocation10 + $0x170] sm:$0xff] }
  0xef   :  { %1931 = vmatprep.subr.bf16.mxu1 %v1930_v47  ;;  %v282_v47 = vmax.f32 %v2969_v50, 0.0  ;;  %v285_v61 = vmax.f32 %v2974_v43, 0.0  ;;  %v1938_v48 = vpack.c.bf16 %v190_v55, %v182_v0  ;;  %v195_v55 = vld [vmem:[#allocation10 + $0x1a0] sm:$0xff]  ;;  %v197_v56 = vld [vmem:[#allocation10 + $0x1b0] sm:$0xff] }
  0xf0   :  { %404 = vmatmul.mubr.f32.vlgmr.msra.gmra.mrb[0].mxu0 %v2967_v58  ;;  %v205_v57 = vld [vmem:[#allocation10 + $0x1f0] sm:$0xff] }
  0xf1   :  { %517 = vmatmul.mubr.f32.vlgmr.msra.gmra.mrb[0].mxu1 %v2967_v58  ;;  %1901 = vmatpush1.bf16.msra.mxu0 %v1900_v54  ;;  %v2983_v54 = vld [vmem:[#allocation7 + $0x10] sm:$0xff]  ;;  %v289_v27 = vmax.f32 %v281_v35, %v285_v61  ;;  %v290_v38 = vmax.f32 %v282_v47, %v286_v44  ;;  %v1912_v35 = vpack.c.bf16 %v203_v31, %v195_v55  ;;  %v214_v47 = vld [vmem:[#allocation10 + $0x238] sm:$0xff]  ;;  %v211_v44 = vld [vmem:[#allocation10 + $0x220] sm:$0xff] }
  0xf2   :  { %1933 = vmatpush1.bf16.msra.mxu1 %v1932_v59  ;;  %409 = vmatprep.mubr.f32.mxu0 %v3487_v51  ;;  %v283_v59 = vmax.f32 %v2983_v54, 0.0  ;;  %v222_v61 = vld [vmem:[#allocation10 + $0x278] sm:$0xff] }
  0xf3   :  { %522 = vmatprep.mubr.f32.mxu1 %v3487_v51  ;;  %1903 = vmatprep.subr.bf16.mxu0 %v1902_v60  ;;  %v2990_v60 = vld [vmem:[#allocation7 + $0x18] sm:$0xff]  ;;  %v1946_v31 = vpack.c.bf16 %v222_v61, %v214_v47 }
  0xf4   :  { %410 = vmatmul.mubr.f32.gmra.mrb[2].mxu0 %v2969_v50  ;;  %1935 = vmatprep.subr.bf16.mxu1 %v1934_v52  ;;  %v1940_v52 = vpack.c.bf16 %v189_v41, %v181_v46  ;;  %v284_v0 = vmax.f32 %v2990_v60, 0.0  ;;  %v220_v46 = vld [vmem:[#allocation10 + $0x268] sm:$0xff]  ;;  %v291_v41 = vmax.f32 %v283_v59, %v287_v45  ;;  %v213_v59 = vld [vmem:[#allocation10 + $0x230] sm:$0xff] }
  0xf5   :  { %523 = vmatmul.mubr.f32.gmra.mrb[2].mxu1 %v2969_v50  ;;  %1905 = vmatpush1.bf16.msra.mxu0 %v1904_v63  ;;  %v1910_v63 = vpack.c.bf16 %v204_v37, %v196_v62  ;;  %v1944_v37 = vpack.c.bf16 %v205_v57, %v197_v56  ;;  %v293_v62 = vmax.f32 %v289_v27, %v290_v38  ;;  %v236_v45 = vld [vmem:[#allocation10 + $0x2e8] sm:$0xff]  ;;  %v230_v56 = vld [vmem:[#allocation10 + $0x2b8] sm:$0xff]  ;;  %v235_v38 = vld [vmem:[#allocation10 + $0x2e0] sm:$0xff] }
  0xf6   :  { %1937 = vmatpush1.bf16.msra.mxu1 %v1936_v42  ;;  %415 = vmatprep.mubr.f32.mxu0 %v3487_v51  ;;  %v1942_v42 = vpack.c.bf16 %v206_v53, %v198_v36  ;;  %v1914_v36 = vpack.c.bf16 %v220_v46, %v212_v29  ;;  %v221_v53 = vld [vmem:[#allocation10 + $0x270] sm:$0xff]  ;;  %v238_v27 = vld [vmem:[#allocation10 + $0x2f8] sm:$0xff]  ;;  %v227_v29 = vld [vmem:[#allocation10 + $0x2a0] sm:$0xff] }
  0xf7   :  { %528 = vmatprep.mubr.f32.mxu1 %v3487_v51  ;;  %1907 = vmatprep.subr.bf16.mxu0 %v1906_v39  ;;  %v219_v39 = vld [vmem:[#allocation10 + $0x260] sm:$0xff]  ;;  %v229_v57 = vld [vmem:[#allocation10 + $0x2b0] sm:$0xff]  ;;  %v1950_v46 = vpack.c.bf16 %v238_v27, %v230_v56  ;;  %v1920_v61 = vpack.c.bf16 %v235_v38, %v227_v29  ;;  %v270_v56 = vld [vmem:[#allocation10 + $0x3f8] sm:$0xff] }
  0xf8   :  { %416 = vmatmul.mubr.f32.gmra.mrb[4].mxu0 %v2983_v54  ;;  %1939 = vmatprep.subr.bf16.mxu1 %v1938_v48  ;;  %v292_v48 = vmax.f32 %v284_v0, %v288_v25  ;;  %v1916_v55 = vpack.c.bf16 %v219_v39, %v211_v44  ;;  %v1948_v25 = vpack.c.bf16 %v221_v53, %v213_v59  ;;  %v254_v44 = vld [vmem:[#allocation10 + $0x378] sm:$0xff]  ;;  %v245_v59 = vld [vmem:[#allocation10 + $0x330] sm:$0xff]  ;;  %v267_v29 = vld [vmem:[#allocation10 + $0x3e0] sm:$0xff] }
  0xf9   :  { %529 = vmatmul.mubr.f32.gmra.mrb[4].mxu1 %v2983_v54  ;;  %1909 = vmatpush1.bf16.msra.mxu0 %v1908_v40  ;;  %v228_v40 = vld [vmem:[#allocation10 + $0x2a8] sm:$0xff]  ;;  %v253_v53 = vld [vmem:[#allocation10 + $0x370] sm:$0xff] }
  0xfa   :  { %1941 = vmatpush1.bf16.msra.mxu1 %v1940_v52  ;;  %421 = vmatprep.mubr.f32.mxu0 %v3487_v51  ;;  %v294_v52 = vmax.f32 %v291_v41, %v292_v48  ;;  %v244_v41 = vld [vmem:[#allocation10 + $0x328] sm:$0xff]  ;;  %v251_v48 = vld [vmem:[#allocation10 + $0x360] sm:$0xff]  ;;  %v1956_v27 = vpack.c.bf16 %v253_v53, %v245_v59 }
  0xfb   :  { %534 = vmatprep.mubr.f32.mxu1 %v3487_v51  ;;  %1911 = vmatprep.subr.bf16.mxu0 %v1910_v63  ;;  %v1918_v63 = vpack.c.bf16 %v236_v45, %v228_v40  ;;  %v260_v40 = vld [vmem:[#allocation10 + $0x3a8] sm:$0xff] }
  0xfc   :  { %422 = vmatmul.mubr.f32.gmra.mrb[6].mxu0 %v2990_v60  ;;  %1943 = vmatprep.subr.bf16.mxu1 %v1942_v42  ;;  %v295_v0 = vmax.f32 %v293_v62, %v294_v52  ;;  %v237_v42 = vld [vmem:[#allocation10 + $0x2f0] sm:$0xff]  ;;  %v243_v62 = vld [vmem:[#allocation10 + $0x320] sm:$0xff]  ;;  %v268_v45 = vld [vmem:[#allocation10 + $0x3e8] sm:$0xff] }
  0xfd   :  { %535 = vmatmul.mubr.f32.gmra.mrb[6].mxu1 %v2990_v60  ;;  %1913 = vmatpush1.bf16.msra.mxu0 %v1912_v35  ;;  %v252_v35 = vld [vmem:[#allocation10 + $0x368] sm:$0xff]  ;;  %v1952_v39 = vpack.c.bf16 %v237_v42, %v229_v57  ;;  %v1924_v52 = vpack.c.bf16 %v251_v48, %v243_v62  ;;  %v1926_v38 = vpack.c.bf16 %v268_v45, %v260_v40 }
  0xfe   :  { %1945 = vmatpush1.bf16.msra.mxu1 %v1944_v37  ;;  %427 = vmatprep.mubr.f32.mxu0 %v3487_v51  ;;  %v296_v47 = vmax.f32 %v295_v0, 0.0  ;;  %v246_v37 = vld [vmem:[#allocation10 + $0x338] sm:$0xff]  ;;  %v261_v0 = vld [vmem:[#allocation10 + $0x3b0] sm:$0xff] }
  0xff   :  { %540 = vmatprep.mubr.f32.mxu1 %v3487_v51  ;;  %1915 = vmatprep.subr.bf16.mxu0 %v1914_v36  ;;  %v1922_v36 = vpack.c.bf16 %v252_v35, %v244_v41 }
 0x100   :  { %428 = vmatmul.mubr.f32.gmra.mrb[8].mxu0 %v2974_v43  ;;  %1947 = vmatprep.subr.bf16.mxu1 %v1946_v31  ;;  %297 = vst [vmem:[#allocation4] sm:$0xff] %v296_v47  ;;  %v1954_v31 = vpack.c.bf16 %v254_v44, %v246_v37 }
 0x101   :  { %541 = vmatmul.mubr.f32.gmra.mrb[8].mxu1 %v2974_v43  ;;  %1917 = vmatpush1.bf16.msra.mxu0 %v1916_v55  ;;  %v262_v55 = vld [vmem:[#allocation10 + $0x3b8] sm:$0xff] }
 0x102   :  { %1949 = vmatpush1.bf16.msra.mxu1 %v1948_v25  ;;  %433 = vmatprep.mubr.f32.mxu0 %v3487_v51  ;;  %v259_v25 = vld [vmem:[#allocation10 + $0x3a0] sm:$0xff]  ;;  %v1958_v57 = vpack.c.bf16 %v270_v56, %v262_v55 }
 0x103   :  { %546 = vmatprep.mubr.f32.mxu1 %v3487_v51  ;;  %1919 = vmatprep.subr.bf16.mxu0 %v1918_v63  ;;  %v269_v63 = vld [vmem:[#allocation10 + $0x3f0] sm:$0xff]  ;;  %v1928_v42 = vpack.c.bf16 %v267_v29, %v259_v25 }
 0x104   :  { %434 = vmatmul.mubr.f32.gmra.mrb[10].mxu0 %v2976_v49  ;;  %1951 = vmatprep.subr.bf16.mxu1 %v1950_v46  ;;  %v1960_v46 = vpack.c.bf16 %v269_v63, %v261_v0 }
 0x105   :  { %547 = vmatmul.mubr.f32.gmra.mrb[10].mxu1 %v2976_v49  ;;  %1921 = vmatpush1.bf16.msra.mxu0 %v1920_v61 }
 0x106   :  { %1953 = vmatpush1.bf16.msra.mxu1 %v1952_v39  ;;  %439 = vmatprep.mubr.f32.mxu0 %v3487_v51 }
 0x107   :  { %552 = vmatprep.mubr.f32.mxu1 %v3487_v51  ;;  %1923 = vmatprep.subr.bf16.mxu0 %v1922_v36 }
 0x108   :  { %440 = vmatmul.mubr.f32.gmra.mrb[12].mxu0 %v2987_v33  ;;  %1955 = vmatprep.subr.bf16.mxu1 %v1954_v31 }
 0x109   :  { %553 = vmatmul.mubr.f32.gmra.mrb[12].mxu1 %v2987_v33  ;;  %1925 = vmatpush1.bf16.msra.mxu0 %v1924_v52 }
 0x10a   :  { %1957 = vmatpush1.bf16.msra.mxu1 %v1956_v27  ;;  %445 = vmatprep.mubr.f32.mxu0 %v3487_v51 }
 0x10b   :  { %558 = vmatprep.mubr.f32.mxu1 %v3487_v51  ;;  %1927 = vmatprep.subr.bf16.mxu0 %v1926_v38 }
 0x10c   :  { %446 = vmatmul.mubr.f32.gmra.mrb[14].mxu0 %v2996_v34  ;;  %1959 = vmatprep.subr.bf16.mxu1 %v1958_v57 }
 0x10d   :  { %559 = vmatmul.mubr.f32.gmra.mrb[14].mxu1 %v2996_v34  ;;  %1929 = vmatpush1.bf16.msra.mxu0 %v1928_v42 }
 0x10e   :  { %1961 = vmatpush1.bf16.msra.mxu1 %v1960_v46  ;;  %629 = vmatprep.mubr.f32.mxu0 %v3487_v51 }
 0x10f   :  { %742 = vmatprep.mubr.f32.mxu1 %v3487_v51 }
 0x110   :  { %630 = vmatmul.mubr.f32.vlgmr.msra.gmra.mrb[16].mxu0 %v2967_v58 }
 0x111   :  { %743 = vmatmul.mubr.f32.vlgmr.msra.gmra.mrb[16].mxu1 %v2967_v58  ;;  %635 = vmatprep.mubr.f32.mxu0 %v3487_v51  ;;  %v299_v58 = vlaneseq }
 0x112   :  { %748 = vmatprep.mubr.f32.mxu1 %v3487_v51 }
 0x114   :  { %636 = vmatmul.mubr.f32.gmra.mrb[18].mxu0 %v2969_v50 }
 0x115   :  { %749 = vmatmul.mubr.f32.gmra.mrb[18].mxu1 %v2969_v50  ;;  %641 = vmatprep.mubr.f32.mxu0 %v3487_v51  ;;  %v3053_v50 = vshrl.u32 %v299_v58, 7 }
 0x116   :  { %754 = vmatprep.mubr.f32.mxu1 %v3487_v51 }
 0x118   :  { %642 = vmatmul.mubr.f32.gmra.mrb[20].mxu0 %v2983_v54 }
 0x119   :  { %755 = vmatmul.mubr.f32.gmra.mrb[20].mxu1 %v2983_v54  ;;  %647 = vmatprep.mubr.f32.mxu0 %v3487_v51  ;;  %v309_v54 = vsub.s32 2, %v3053_v50 }
 0x11a   :  { %760 = vmatprep.mubr.f32.mxu1 %v3487_v51 }
 0x11c   :  { %648 = vmatmul.mubr.f32.gmra.mrb[22].mxu0 %v2990_v60 }
 0x11d   :  { %761 = vmatmul.mubr.f32.gmra.mrb[22].mxu1 %v2990_v60  ;;  %653 = vmatprep.mubr.f32.mxu0 %v3487_v51  ;;  %v305_v60 = vsub.s32 1, %v3053_v50 }
 0x11e   :  { %766 = vmatprep.mubr.f32.mxu1 %v3487_v51 }
 0x120   :  { %654 = vmatmul.mubr.f32.gmra.mrb[24].mxu0 %v2974_v43 }
 0x121   :  { %767 = vmatmul.mubr.f32.gmra.mrb[24].mxu1 %v2974_v43  ;;  %659 = vmatprep.mubr.f32.mxu0 %v3487_v51  ;;  %v301_v43 = vsub.s32 0, %v3053_v50 }
 0x122   :  { %772 = vmatprep.mubr.f32.mxu1 %v3487_v51 }
 0x124   :  { %660 = vmatmul.mubr.f32.gmra.mrb[26].mxu0 %v2976_v49 }
 0x125   :  { %773 = vmatmul.mubr.f32.gmra.mrb[26].mxu1 %v2976_v49  ;;  %665 = vmatprep.mubr.f32.mxu0 %v3487_v51  ;;  %v3056_v49 = vld [vmem:[#allocation12] sm:$0xff] }
 0x126   :  { %778 = vmatprep.mubr.f32.mxu1 %v3487_v51  ;;  %v3062_v41 = vrot.slane %v3056_v49, %v301_v43 }
 0x128   :  { %666 = vmatmul.mubr.f32.gmra.mrb[28].mxu0 %v2987_v33 }
 0x129   :  { %779 = vmatmul.mubr.f32.gmra.mrb[28].mxu1 %v2987_v33  ;;  %671 = vmatprep.mubr.f32.mxu0 %v3487_v51  ;;  %v313_v33 = vsub.s32 3, %v3053_v50 }
 0x12a   :  { %784 = vmatprep.mubr.f32.mxu1 %v3487_v51  ;;  %v3065_v51 = vrot.slane %v3056_v49, %v309_v54 }
 0x12b   :  { %v3071_v35 = vrot.slane %v3056_v49, %v313_v33 }
 0x12c   :  { %672 = vmatmul.mubr.f32.gmra.mrb[30].mxu0 %v2996_v34 }
 0x12d   :  { %785 = vmatmul.mubr.f32.gmra.mrb[30].mxu1 %v2996_v34  ;;  %v3068_v34 = vrot.slane %v3056_v49, %v305_v60 }
 0x1c3   :  { %v405_v47 = vpop.f32.mrb[0].mxu0 }
 0x1c4   :  { %v406_v61 = vadd.f32 %v405_v47, %v3062_v41  ;;  %v518_v37 = vpop.f32.mrb[0].mxu1  ;;  %v407_v44 = vpop.f32.mrb[1].mxu0 }
 0x1c5   :  { %v519_v39 = vadd.f32 %v518_v37, %v3065_v51  ;;  %v408_v62 = vadd.f32 %v407_v44, %v3068_v34  ;;  %v520_v48 = vpop.f32.mrb[1].mxu1 }
 0x1c6   :  { %791 = vst [vmem:[#allocation2] sm:$0xff] %v406_v61  ;;  %v521_v36 = vadd.f32 %v520_v48, %v3071_v35 }
 0x1c7   :  { %793 = vst [vmem:[#allocation2 + $0x10] sm:$0xff] %v519_v39  ;;  %792 = vst [vmem:[#allocation2 + $0x8] sm:$0xff] %v408_v62  ;;  %v411_v59 = vpop.f32.mrb[2].mxu0 }
 0x1c8   :  { %794 = vst [vmem:[#allocation2 + $0x18] sm:$0xff] %v521_v36  ;;  %v412_v53 = vadd.f32 %v411_v59, %v3062_v41  ;;  %v524_v31 = vpop.f32.mrb[2].mxu1  ;;  %v413_v40 = vpop.f32.mrb[3].mxu0 }
 0x1c9   :  { %v525_v45 = vadd.f32 %v524_v31, %v3065_v51  ;;  %v414_v52 = vadd.f32 %v413_v40, %v3068_v34  ;;  %v526_v55 = vpop.f32.mrb[3].mxu1 }
 0x1ca   :  { %795 = vst [vmem:[#allocation2 + $0x20] sm:$0xff] %v412_v53  ;;  %v527_v56 = vadd.f32 %v526_v55, %v3071_v35 }
 0x1cb   :  { %797 = vst [vmem:[#allocation2 + $0x30] sm:$0xff] %v525_v45  ;;  %796 = vst [vmem:[#allocation2 + $0x28] sm:$0xff] %v414_v52  ;;  %v417_v27 = vpop.f32.mrb[4].mxu0 }
 0x1cc   :  { %798 = vst [vmem:[#allocation2 + $0x38] sm:$0xff] %v527_v56  ;;  %v418_v25 = vadd.f32 %v417_v27, %v3062_v41  ;;  %v530_v29 = vpop.f32.mrb[4].mxu1  ;;  %v419_v38 = vpop.f32.mrb[5].mxu0 }
 0x1cd   :  { %v531_v0 = vadd.f32 %v530_v29, %v3065_v51  ;;  %v420_v63 = vadd.f32 %v419_v38, %v3068_v34  ;;  %v532_v57 = vpop.f32.mrb[5].mxu1 }
 0x1ce   :  { %799 = vst [vmem:[#allocation2 + $0x40] sm:$0xff] %v418_v25  ;;  %v533_v42 = vadd.f32 %v532_v57, %v3071_v35  ;;  %v317_v57 = vsub.s32 4, %v3053_v50 }
 0x1cf   :  { %801 = vst [vmem:[#allocation2 + $0x50] sm:$0xff] %v531_v0  ;;  %800 = vst [vmem:[#allocation2 + $0x48] sm:$0xff] %v420_v63  ;;  %v423_v46 = vpop.f32.mrb[6].mxu0 }
 0x1d0   :  { %802 = vst [vmem:[#allocation2 + $0x58] sm:$0xff] %v533_v42  ;;  %v424_v58 = vadd.f32 %v423_v46, %v3062_v41  ;;  %v536_v43 = vpop.f32.mrb[6].mxu1  ;;  %v425_v54 = vpop.f32.mrb[7].mxu0 }
 0x1d1   :  { %v537_v60 = vadd.f32 %v536_v43, %v3065_v51  ;;  %v426_v33 = vadd.f32 %v425_v54, %v3068_v34  ;;  %v538_v47 = vpop.f32.mrb[7].mxu1  ;;  %v325_v43 = vsub.s32 6, %v3053_v50  ;;  %v321_v54 = vsub.s32 5, %v3053_v50 }
 0x1d2   :  { %803 = vst [vmem:[#allocation2 + $0x60] sm:$0xff] %v424_v58  ;;  %v539_v61 = vadd.f32 %v538_v47, %v3071_v35 }
 0x1d3   :  { %805 = vst [vmem:[#allocation2 + $0x70] sm:$0xff] %v537_v60  ;;  %804 = vst [vmem:[#allocation2 + $0x68] sm:$0xff] %v426_v33  ;;  %v429_v37 = vpop.f32.mrb[8].mxu0  ;;  %v329_v33 = vsub.s32 7, %v3053_v50  ;;  %v3115_v50 = vrot.slane %v3056_v49, %v321_v54 }
 0x1d4   :  { %806 = vst [vmem:[#allocation2 + $0x78] sm:$0xff] %v539_v61  ;;  %v430_v44 = vadd.f32 %v429_v37, %v3062_v41  ;;  %v542_v39 = vpop.f32.mrb[8].mxu1  ;;  %v431_v62 = vpop.f32.mrb[9].mxu0 }
 0x1d5   :  { %v543_v48 = vadd.f32 %v542_v39, %v3065_v51  ;;  %v432_v36 = vadd.f32 %v431_v62, %v3068_v34  ;;  %v544_v59 = vpop.f32.mrb[9].mxu1  ;;  %v3107_v39 = vrot.slane %v3056_v49, %v317_v57 }
 0x1d6   :  { %807 = vst [vmem:[#allocation2 + $0x80] sm:$0xff] %v430_v44  ;;  %v545_v53 = vadd.f32 %v544_v59, %v3071_v35  ;;  %v3112_v59 = vrot.slane %v3056_v49, %v325_v43 }
 0x1d7   :  { %809 = vst [vmem:[#allocation2 + $0x90] sm:$0xff] %v543_v48  ;;  %808 = vst [vmem:[#allocation2 + $0x88] sm:$0xff] %v432_v36  ;;  %v435_v31 = vpop.f32.mrb[10].mxu0 }
 0x1d8   :  { %810 = vst [vmem:[#allocation2 + $0x98] sm:$0xff] %v545_v53  ;;  %v436_v40 = vadd.f32 %v435_v31, %v3062_v41  ;;  %v548_v45 = vpop.f32.mrb[10].mxu1  ;;  %v437_v52 = vpop.f32.mrb[11].mxu0 }
 0x1d9   :  { %v549_v55 = vadd.f32 %v548_v45, %v3065_v51  ;;  %v438_v56 = vadd.f32 %v437_v52, %v3068_v34  ;;  %v550_v27 = vpop.f32.mrb[11].mxu1 }
 0x1da   :  { %811 = vst [vmem:[#allocation2 + $0xa0] sm:$0xff] %v436_v40  ;;  %v551_v25 = vadd.f32 %v550_v27, %v3071_v35 }
 0x1db   :  { %813 = vst [vmem:[#allocation2 + $0xb0] sm:$0xff] %v549_v55  ;;  %812 = vst [vmem:[#allocation2 + $0xa8] sm:$0xff] %v438_v56  ;;  %v441_v29 = vpop.f32.mrb[12].mxu0 }
 0x1dc   :  { %814 = vst [vmem:[#allocation2 + $0xb8] sm:$0xff] %v551_v25  ;;  %v442_v38 = vadd.f32 %v441_v29, %v3062_v41  ;;  %v554_v0 = vpop.f32.mrb[12].mxu1  ;;  %v443_v63 = vpop.f32.mrb[13].mxu0 }
 0x1dd   :  { %v555_v42 = vadd.f32 %v554_v0, %v3065_v51  ;;  %v444_v46 = vadd.f32 %v443_v63, %v3068_v34  ;;  %v556_v58 = vpop.f32.mrb[13].mxu1 }
 0x1de   :  { %815 = vst [vmem:[#allocation2 + $0xc0] sm:$0xff] %v442_v38  ;;  %v557_v60 = vadd.f32 %v556_v58, %v3071_v35 }
 0x1df   :  { %817 = vst [vmem:[#allocation2 + $0xd0] sm:$0xff] %v555_v42  ;;  %816 = vst [vmem:[#allocation2 + $0xc8] sm:$0xff] %v444_v46  ;;  %v447_v47 = vpop.f32.mrb[14].mxu0 }
 0x1e0   :  { %818 = vst [vmem:[#allocation2 + $0xd8] sm:$0xff] %v557_v60  ;;  %v448_v61 = vadd.f32 %v447_v47, %v3062_v41  ;;  %v560_v37 = vpop.f32.mrb[14].mxu1  ;;  %v449_v44 = vpop.f32.mrb[15].mxu0  ;;  %v3119_v41 = vrot.slane %v3056_v49, %v329_v33 }
 0x1e1   :  { %v561_v62 = vadd.f32 %v560_v37, %v3065_v51  ;;  %v450_v48 = vadd.f32 %v449_v44, %v3068_v34  ;;  %v562_v36 = vpop.f32.mrb[15].mxu1 }
 0x1e2   :  { %819 = vst [vmem:[#allocation2 + $0xe0] sm:$0xff] %v448_v61  ;;  %v563_v53 = vadd.f32 %v562_v36, %v3071_v35 }
 0x1e3   :  { %821 = vst [vmem:[#allocation2 + $0xf0] sm:$0xff] %v561_v62  ;;  %820 = vst [vmem:[#allocation2 + $0xe8] sm:$0xff] %v450_v48  ;;  %v631_v31 = vpop.f32.mrb[16].mxu0 }
 0x1e4   :  { %822 = vst [vmem:[#allocation2 + $0xf8] sm:$0xff] %v563_v53  ;;  %v632_v51 = vadd.f32 %v631_v31, %v3107_v39  ;;  %v744_v34 = vpop.f32.mrb[16].mxu1  ;;  %v633_v40 = vpop.f32.mrb[17].mxu0 }
 0x1e5   :  { %v745_v45 = vadd.f32 %v744_v34, %v3112_v59  ;;  %v634_v52 = vadd.f32 %v633_v40, %v3115_v50  ;;  %v746_v55 = vpop.f32.mrb[17].mxu1 }
 0x1e6   :  { %823 = vst [vmem:[#allocation3] sm:$0xff] %v632_v51  ;;  %v747_v56 = vadd.f32 %v746_v55, %v3119_v41 }
 0x1e7   :  { %825 = vst [vmem:[#allocation3 + $0x10] sm:$0xff] %v745_v45  ;;  %824 = vst [vmem:[#allocation3 + $0x8] sm:$0xff] %v634_v52  ;;  %v637_v49 = vpop.f32.mrb[18].mxu0 }
 0x1e8   :  { %826 = vst [vmem:[#allocation3 + $0x18] sm:$0xff] %v747_v56  ;;  %v638_v35 = vadd.f32 %v637_v49, %v3107_v39  ;;  %v750_v27 = vpop.f32.mrb[18].mxu1  ;;  %v639_v25 = vpop.f32.mrb[19].mxu0 }
 0x1e9   :  { %v751_v29 = vadd.f32 %v750_v27, %v3112_v59  ;;  %v640_v38 = vadd.f32 %v639_v25, %v3115_v50  ;;  %v752_v0 = vpop.f32.mrb[19].mxu1 }
 0x1ea   :  { %827 = vst [vmem:[#allocation3 + $0x20] sm:$0xff] %v638_v35  ;;  %v753_v63 = vadd.f32 %v752_v0, %v3119_v41 }
 0x1eb   :  { %829 = vst [vmem:[#allocation3 + $0x30] sm:$0xff] %v751_v29  ;;  %828 = vst [vmem:[#allocation3 + $0x28] sm:$0xff] %v640_v38  ;;  %v643_v57 = vpop.f32.mrb[20].mxu0 }
 0x1ec   :  { %830 = vst [vmem:[#allocation3 + $0x38] sm:$0xff] %v753_v63  ;;  %v644_v42 = vadd.f32 %v643_v57, %v3107_v39  ;;  %v756_v46 = vpop.f32.mrb[20].mxu1  ;;  %v645_v58 = vpop.f32.mrb[21].mxu0 }
 0x1ed   :  { %v757_v43 = vadd.f32 %v756_v46, %v3112_v59  ;;  %v646_v54 = vadd.f32 %v645_v58, %v3115_v50  ;;  %v758_v60 = vpop.f32.mrb[21].mxu1 }
 0x1ee   :  { %831 = vst [vmem:[#allocation3 + $0x40] sm:$0xff] %v644_v42  ;;  %v759_v33 = vadd.f32 %v758_v60, %v3119_v41 }
 0x1ef   :  { %833 = vst [vmem:[#allocation3 + $0x50] sm:$0xff] %v757_v43  ;;  %832 = vst [vmem:[#allocation3 + $0x48] sm:$0xff] %v646_v54  ;;  %v649_v47 = vpop.f32.mrb[22].mxu0 }
 0x1f0   :  { %834 = vst [vmem:[#allocation3 + $0x58] sm:$0xff] %v759_v33  ;;  %v650_v61 = vadd.f32 %v649_v47, %v3107_v39  ;;  %v762_v37 = vpop.f32.mrb[22].mxu1  ;;  %v651_v44 = vpop.f32.mrb[23].mxu0 }
 0x1f1   :  { %v763_v62 = vadd.f32 %v762_v37, %v3112_v59  ;;  %v652_v48 = vadd.f32 %v651_v44, %v3115_v50  ;;  %v764_v36 = vpop.f32.mrb[23].mxu1 }
 0x1f2   :  { %835 = vst [vmem:[#allocation3 + $0x60] sm:$0xff] %v650_v61  ;;  %v765_v53 = vadd.f32 %v764_v36, %v3119_v41 }
 0x1f3   :  { %837 = vst [vmem:[#allocation3 + $0x70] sm:$0xff] %v763_v62  ;;  %836 = vst [vmem:[#allocation3 + $0x68] sm:$0xff] %v652_v48  ;;  %v655_v31 = vpop.f32.mrb[24].mxu0 }
 0x1f4   :  { %838 = vst [vmem:[#allocation3 + $0x78] sm:$0xff] %v765_v53  ;;  %v656_v51 = vadd.f32 %v655_v31, %v3107_v39  ;;  %v768_v34 = vpop.f32.mrb[24].mxu1  ;;  %v657_v40 = vpop.f32.mrb[25].mxu0  ;;  %v3153_v31 = vmov 0.0  }
 0x1f5   :  { %v769_v45 = vadd.f32 %v768_v34, %v3112_v59  ;;  %v658_v52 = vadd.f32 %v657_v40, %v3115_v50  ;;  %v770_v55 = vpop.f32.mrb[25].mxu1  ;;  %v3157_v34 = vmov 0.0  }
 0x1f6   :  { %839 = vst [vmem:[#allocation3 + $0x80] sm:$0xff] %v656_v51  ;;  %v771_v56 = vadd.f32 %v770_v55, %v3119_v41  ;;  %v3155_v51 = vmov 0.0  }
 0x1f7   :  { %841 = vst [vmem:[#allocation3 + $0x90] sm:$0xff] %v769_v45  ;;  %840 = vst [vmem:[#allocation3 + $0x88] sm:$0xff] %v658_v52  ;;  %v661_v49 = vpop.f32.mrb[26].mxu0 }
 0x1f8   :  { %842 = vst [vmem:[#allocation3 + $0x98] sm:$0xff] %v771_v56  ;;  %v662_v35 = vadd.f32 %v661_v49, %v3107_v39  ;;  %v774_v27 = vpop.f32.mrb[26].mxu1  ;;  %v663_v25 = vpop.f32.mrb[27].mxu0 }
 0x1f9   :  { %v775_v29 = vadd.f32 %v774_v27, %v3112_v59  ;;  %v664_v38 = vadd.f32 %v663_v25, %v3115_v50  ;;  %v776_v0 = vpop.f32.mrb[27].mxu1 }
 0x1fa   :  { %843 = vst [vmem:[#allocation3 + $0xa0] sm:$0xff] %v662_v35  ;;  %v777_v63 = vadd.f32 %v776_v0, %v3119_v41 }
 0x1fb   :  { %845 = vst [vmem:[#allocation3 + $0xb0] sm:$0xff] %v775_v29  ;;  %844 = vst [vmem:[#allocation3 + $0xa8] sm:$0xff] %v664_v38  ;;  %v667_v57 = vpop.f32.mrb[28].mxu0 }
 0x1fc   :  { %846 = vst [vmem:[#allocation3 + $0xb8] sm:$0xff] %v777_v63  ;;  %v668_v42 = vadd.f32 %v667_v57, %v3107_v39  ;;  %v780_v46 = vpop.f32.mrb[28].mxu1  ;;  %v669_v58 = vpop.f32.mrb[29].mxu0 }
 0x1fd   :  { %v781_v43 = vadd.f32 %v780_v46, %v3112_v59  ;;  %v670_v54 = vadd.f32 %v669_v58, %v3115_v50  ;;  %v782_v60 = vpop.f32.mrb[29].mxu1 }
 0x1fe   :  { %847 = vst [vmem:[#allocation3 + $0xc0] sm:$0xff] %v668_v42  ;;  %v783_v33 = vadd.f32 %v782_v60, %v3119_v41 }
 0x1ff   :  { %849 = vst [vmem:[#allocation3 + $0xd0] sm:$0xff] %v781_v43  ;;  %848 = vst [vmem:[#allocation3 + $0xc8] sm:$0xff] %v670_v54  ;;  %v673_v47 = vpop.f32.mrb[30].mxu0 }
 0x200   :  { %850 = vst [vmem:[#allocation3 + $0xd8] sm:$0xff] %v783_v33  ;;  %v674_v61 = vadd.f32 %v673_v47, %v3107_v39  ;;  %v786_v37 = vpop.f32.mrb[30].mxu1  ;;  %v675_v44 = vpop.f32.mrb[31].mxu0  ;;  %v3159_v39 = vmov 0.0  }
 0x201   :  { %v787_v62 = vadd.f32 %v786_v37, %v3112_v59  ;;  %v676_v48 = vadd.f32 %v675_v44, %v3115_v50  ;;  %v788_v36 = vpop.f32.mrb[31].mxu1 }
 0x202   :  { %851 = vst [vmem:[#allocation3 + $0xe0] sm:$0xff] %v674_v61  ;;  %v789_v53 = vadd.f32 %v788_v36, %v3119_v41 }
 0x203   :  { %853 = vst [vmem:[#allocation3 + $0xf0] sm:$0xff] %v787_v62  ;;  %852 = vst [vmem:[#allocation3 + $0xe8] sm:$0xff] %v676_v48 }
 0x204   :  { %854 = vst [vmem:[#allocation3 + $0xf8] sm:$0xff] %v789_v53 }
 0x205 LB: > { %v1962_v59 = vpack.c.bf16 %v2721_v6, %v2713_v2  ;;  %v1964_v50 = vpack.c.bf16 %v2719_v5, %v2711_v1  ;;  %v1966_v41 = vpack.c.bf16 %v2737_v14, %v2729_v10  ;;  %v1994_v40 = vpack.c.bf16 %v2725_v8, %v2717_v4  ;;  %v3488_v63 = vld [vmem:[#allocation28_spill] sm:$0xff]  ;;  %v3489_v57 = vld [vmem:[#allocation30_spill] sm:$0xff]  ;;  %v3490_v46 = vld [vmem:[#allocation33_spill] sm:$0xff]  ;;  %s1676_s24 = sshll.u32 %s2501_s7, 5  ;;  %s1173_s2 = ssub.s32 7, %s2501_s7  ;;  %s2501_s7 = sphi %s3161_s7, %s988_s7   ;;  %v2497_v39 = vphi %v3159_v39, %v3588_v39   ;;  %v2493_v34 = vphi %v3157_v34, %v1167_v34   ;;  %v2489_v51 = vphi %v3155_v51, %v1350_v51   ;;  %v2485_v31 = vphi %v3153_v31, %v1348_v31  }
 0x206   : > { %v1996_v45 = vpack.c.bf16 %v2723_v7, %v2715_v3  ;;  %v1968_v52 = vpack.c.bf16 %v2735_v13, %v2727_v9  ;;  %v1998_v55 = vpack.c.bf16 %v2741_v16, %v2733_v12  ;;  %v1970_v56 = vpack.c.bf16 %v2753_v22, %v2745_v18  ;;  %v3491_v58 = vld [vmem:[#allocation37_spill] sm:$0xff]  ;;  %v3493_v60 = vld [vmem:[#allocation31_spill] sm:$0xff]  ;;  %v3496_v44 = vld [vmem:[#allocation32_spill] sm:$0xff]  ;;  %s995_s27 = scalar_lea.vmem [#allocation2], %s1676_s24  ;;  %s1677_s21 = sshll.u32 %s1173_s2, 5 }
 0x207   : > { %1963 = vmatprep.subr.bf16.mxu0 %v1962_v59  ;;  %1995 = vmatprep.subr.bf16.mxu1 %v1994_v40  ;;  %v2000_v49 = vpack.c.bf16 %v2739_v15, %v2731_v11  ;;  %v2002_v35 = vpack.c.bf16 %v2757_v24, %v2749_v20  ;;  %v2518_v27 = vmov 0.0   ;;  %v1972_v25 = vpack.c.bf16 %v2751_v21, %v2743_v17  ;;  %v3492_v54 = vld [vmem:[#allocation29_spill] sm:$0xff]  ;;  %v3494_v47 = vld [vmem:[#allocation35_spill] sm:$0xff]  ;;  %v3497_v62 = vld [vmem:[#allocation36_spill] sm:$0xff]  ;;  %s1176_s22 = scalar_lea.vmem [#allocation3], %s1677_s21  ;;  %s988_s7 = sadd.s32 1, %s2501_s7  }
 0x208   : > { %1965 = vmatpush1.bf16.msra.mxu0 %v1964_v50  ;;  %1997 = vmatpush1.bf16.msra.mxu1 %v1996_v45  ;;  %v1974_v29 = vpack.c.bf16 %v2769_v30, %v2761_v26  ;;  %v2004_v38 = vpack.c.bf16 %v2755_v23, %v2747_v19  ;;  %v2006_v0 = vpack.c.bf16 %v2773_v32, %v2765_v28  ;;  %v3495_v61 = vld [vmem:[#allocation39_spill] sm:$0xff]  ;;  %v3498_v36 = vld [vmem:[#allocation41_spill] sm:$0xff]  ;;  %v3500_v50 = vld [vmem:[#allocation34_spill] sm:$0xff]  ;;  %p985_p8 = scmp.ge.s32.totalorder %s988_s7, 8  }
 0x209   : > { %1967 = vmatprep.subr.bf16.mxu0 %v1966_v41  ;;  %1999 = vmatprep.subr.bf16.mxu1 %v1998_v55  ;;  %v1976_v42 = vpack.c.bf16 %v3489_v57, %v3488_v63  ;;  %v1978_v43 = vpack.c.bf16 %v3491_v58, %v3490_v46  ;;  %v2008_v33 = vpack.c.bf16 %v3493_v60, %v3492_v54  ;;  %v3499_v53 = vld [vmem:[#allocation45_spill] sm:$0xff]  ;;  %v3501_v41 = vld [vmem:[#allocation38_spill] sm:$0xff]  ;;  %v3502_v45 = vld [vmem:[#allocation43_spill] sm:$0xff]  ;;  %vm2520_vm0 = vmmov (%p985_p8), 0   ;;  %s2521_s3 = smov (%p985_p8), [#allocation21]  }
 0x20a   : > { %1064 = vmatprep.mubr.f32.mxu0 %v2518_v27  ;;  %1135 = vmatprep.mubr.f32.mxu1 %v2518_v27  ;;  %v2010_v37 = vpack.c.bf16 %v3495_v61, %v3494_v47  ;;  %v1980_v48 = vpack.c.bf16 %v3497_v62, %v3496_v44  ;;  %v1982_v59 = vpack.c.bf16 %v3499_v53, %v3498_v36  ;;  %v3509_v63 = vld [vmem:[#allocation46_spill] sm:$0xff]  ;;  %v3511_v46 = vld [vmem:[#allocation55_spill] sm:$0xff]  ;;  %v3513_v54 = vld [vmem:[#allocation52_spill] sm:$0xff]  ;;  %s1631_s28 = sshll.u32 (%p985_p8), %s2521_s3, 4  ;;  %s1632_s28 = int_to_ptr.vmem [resolvable:$true] %s1631_s28 }
 0x20b   : > { %v2012_v40 = vpack.c.bf16 %v3501_v41, %v3500_v50  ;;  %v3515_v47 = vld [vmem:[#allocation61_spill] sm:$0xff]  ;;  %v3517_v44 = vld [vmem:[#allocation54_spill] sm:$0xff]  ;;  %v3519_v36 = vld [vmem:[#allocation63_spill] sm:$0xff]  ;;  %s2429_s29 = scalar_lea.vmem (%p985_p8), %s1632_s28, 128  ;;  %p2434_p10 = scmp.lt.s32.totalorder (%p985_p8), %s1632_s28, %s1632_s28 }
 0x20c   : > { %1969 = vmatpush1.bf16.msra.mxu0 %v1968_v52  ;;  %2001 = vmatpush1.bf16.msra.mxu1 %v2000_v49  ;;  %v3503_v52 = vld [vmem:[#allocation47_spill] sm:$0xff]  ;;  %v3505_v49 = vld [vmem:[#allocation44_spill] sm:$0xff]  ;;  %v1378_v9 = vld [vmem:[#allocation18 + $0x30] sm:$0xff] (%p985_p8)  ;;  %p2430_p9 = scmp.ne.s32.totalorder (%p985_p8), %s1632_s28, %s2429_s29  ;;  %p2435_p11 = scmp.lt.s32.totalorder (%p985_p8), %s2429_s29, %s2429_s29 }
 0x20d   : > { %1971 = vmatprep.subr.bf16.mxu0 %v1970_v56  ;;  %2003 = vmatprep.subr.bf16.mxu1 %v2002_v35  ;;  %v2014_v55 = vpack.c.bf16 %v3503_v52, %v3502_v45  ;;  %v3504_v56 = vld [vmem:[#allocation40_spill] sm:$0xff]  ;;  %v3523_v45 = vld [vmem:[#allocation69_spill] sm:$0xff]  ;;  %v1376_v3 = vld [vmem:[#allocation18 + $0x20] sm:$0xff] (%p985_p8) }
 0x20e   : > { %v1984_v35 = vpack.c.bf16 %v3505_v49, %v3504_v56  ;;  %v3521_v50 = vld [vmem:[#allocation60_spill] sm:$0xff]  ;;  %v3525_v56 = vld [vmem:[#allocation62_spill] sm:$0xff]  ;;  %v1359_v5 = vld [vmem:[#allocation16 + $0x20] sm:$0xff] (%p985_p8)  ;;  %p2436_p12 = por (%p985_p8), %p2435_p11, %p2434_p10 }
 0x20f   :  { %v1377_v4 = vld [vmem:[#allocation18 + $0x28] sm:$0xff] (%p985_p8)  ;;  %v1379_v10 = vld [vmem:[#allocation18 + $0x38] sm:$0xff] (%p985_p8)  ;;  %v1361_v11 = vld [vmem:[#allocation16 + $0x30] sm:$0xff] (%p985_p8) }
 0x210   : > { %1973 = vmatpush1.bf16.msra.mxu0 %v1972_v25  ;;  %2005 = vmatpush1.bf16.msra.mxu1 %v2004_v38  ;;  %v3506_v25 = vld [vmem:[#allocation49_spill] sm:$0xff]  ;;  %v1360_v6 = vld [vmem:[#allocation16 + $0x28] sm:$0xff] (%p985_p8)  ;;  %v2097_v7 = vpack.c.bf16 (%p985_p8), %v1377_v4, %v1376_v3  ;;  %v1362_v12 = vld [vmem:[#allocation16 + $0x38] sm:$0xff] (%p985_p8)  ;;  %v2100_v13 = vpack.c.bf16 (%p985_p8), %v1379_v10, %v1378_v9  ;;  %p2437_p13 = pnand (%p985_p8), %p2436_p12, %p2430_p9 }
 0x211   : > { %1975 = vmatprep.subr.bf16.mxu0 %v1974_v29  ;;  %2007 = vmatprep.subr.bf16.mxu1 %v2006_v0  ;;  %v3507_v29 = vld [vmem:[#allocation53_spill] sm:$0xff]  ;;  %v3508_v0 = vld [vmem:[#allocation42_spill] sm:$0xff]  ;;  %v2121_v8 = vpack.c.bf16 (%p985_p8), %v1360_v6, %v1359_v5  ;;  %v2124_v14 = vpack.c.bf16 (%p985_p8), %v1362_v12, %v1361_v11  ;;  %v1380_v15 = vld [vmem:[#allocation18 + $0x40] sm:$0xff] (%p985_p8) }
 0x212   : > { %v1986_v38 = vpack.c.bf16 %v3507_v29, %v3506_v25  ;;  %v2016_v57 = vpack.c.bf16 %v3509_v63, %v3508_v0  ;;  %v3527_v25 = vld [vmem:[#allocation71_spill] sm:$0xff]  ;;  %v3529_v0 = vld [vmem:[#allocation68_spill] sm:$0xff]  ;;  %v1382_v21 = vld [vmem:[#allocation18 + $0x50] sm:$0xff] (%p985_p8) }
 0x213   :  { %v1381_v16 = vld [vmem:[#allocation18 + $0x48] sm:$0xff] (%p985_p8)  ;;  %v1363_v17 = vld [vmem:[#allocation16 + $0x40] sm:$0xff] (%p985_p8)  ;;  %v1383_v22 = vld [vmem:[#allocation18 + $0x58] sm:$0xff] (%p985_p8) }
 0x214   : > { %1977 = vmatpush1.bf16.msra.mxu0 %v1976_v42  ;;  %2009 = vmatpush1.bf16.msra.mxu1 %v2008_v33  ;;  %v3510_v42 = vld [vmem:[#allocation51_spill] sm:$0xff]  ;;  %v3514_v33 = vld [vmem:[#allocation57_spill] sm:$0xff]  ;;  %v1364_v18 = vld [vmem:[#allocation16 + $0x48] sm:$0xff] (%p985_p8)  ;;  %v2103_v19 = vpack.c.bf16 (%p985_p8), %v1381_v16, %v1380_v15  ;;  %v2106_v26 = vpack.c.bf16 (%p985_p8), %v1383_v22, %v1382_v21 }
 0x215   : > { %1979 = vmatprep.subr.bf16.mxu0 %v1978_v43  ;;  %2011 = vmatprep.subr.bf16.mxu1 %v2010_v37  ;;  %v2018_v58 = vpack.c.bf16 %v3511_v46, %v3510_v42  ;;  %v3512_v43 = vld [vmem:[#allocation48_spill] sm:$0xff]  ;;  %v1990_v61 = vpack.c.bf16 %v3515_v47, %v3514_v33  ;;  %v3516_v37 = vld [vmem:[#allocation50_spill] sm:$0xff]  ;;  %v3531_v42 = vld [vmem:[#allocation77_spill] sm:$0xff]  ;;  %v2127_v20 = vpack.c.bf16 (%p985_p8), %v1364_v18, %v1363_v17 }
 0x216   : > { %v1988_v60 = vpack.c.bf16 %v3513_v54, %v3512_v43  ;;  %v2020_v62 = vpack.c.bf16 %v3517_v44, %v3516_v37  ;;  %v3533_v43 = vld [vmem:[#allocation70_spill] sm:$0xff]  ;;  %v3535_v33 = vld [vmem:[#allocation79_spill] sm:$0xff]  ;;  %v3537_v37 = vld [vmem:[#allocation76_spill] sm:$0xff] }
 0x217   :  { %v1365_v23 = vld [vmem:[#allocation16 + $0x50] sm:$0xff] (%p985_p8)  ;;  %v1366_v24 = vld [vmem:[#allocation16 + $0x58] sm:$0xff] (%p985_p8)  ;;  %v1384_v30 = vld [vmem:[#allocation18 + $0x60] sm:$0xff] (%p985_p8) }
 0x218   : > { %1981 = vmatpush1.bf16.msra.mxu0 %v1980_v48  ;;  %2013 = vmatpush1.bf16.msra.mxu1 %v2012_v40  ;;  %v3518_v48 = vld [vmem:[#allocation59_spill] sm:$0xff]  ;;  %v3522_v40 = vld [vmem:[#allocation65_spill] sm:$0xff]  ;;  %v2130_v28 = vpack.c.bf16 (%p985_p8), %v1366_v24, %v1365_v23  ;;  %v1385_v32 = vld [vmem:[#allocation18 + $0x68] sm:$0xff] (%p985_p8) }
 0x219   : > { %1983 = vmatprep.subr.bf16.mxu0 %v1982_v59  ;;  %2015 = vmatprep.subr.bf16.mxu1 %v2014_v55  ;;  %v2022_v53 = vpack.c.bf16 %v3519_v36, %v3518_v48  ;;  %v3520_v59 = vld [vmem:[#allocation56_spill] sm:$0xff]  ;;  %v2026_v52 = vpack.c.bf16 %v3523_v45, %v3522_v40  ;;  %v3524_v55 = vld [vmem:[#allocation58_spill] sm:$0xff]  ;;  %v3539_v48 = vld [vmem:[#allocation85_spill] sm:$0xff] }
 0x21a   : > { %v1992_v41 = vpack.c.bf16 %v3521_v50, %v3520_v59  ;;  %v2024_v49 = vpack.c.bf16 %v3525_v56, %v3524_v55  ;;  %v3541_v59 = vld [vmem:[#allocation78_spill] sm:$0xff]  ;;  %v3543_v40 = vld [vmem:[#allocation87_spill] sm:$0xff]  ;;  %v3545_v55 = vld [vmem:[#allocation84_spill] sm:$0xff] }
 0x21b   :  { %v1675_v9 = vld [vmem:[%s3382_s8] ss:$0 sm:$0xff] (%p985_p8) }
 0x21c   : > { %1985 = vmatpush1.bf16.msra.mxu0 %v1984_v35  ;;  %2017 = vmatpush1.bf16.msra.mxu1 %v2016_v57  ;;  %v3526_v35 = vld [vmem:[#allocation67_spill] sm:$0xff]  ;;  %v3530_v57 = vld [vmem:[#allocation73_spill] sm:$0xff] }
 0x21d   : > { %1987 = vmatprep.subr.bf16.mxu0 %v1986_v38  ;;  %2019 = vmatprep.subr.bf16.mxu1 %v2018_v58  ;;  %v2058_v29 = vpack.c.bf16 %v3527_v25, %v3526_v35  ;;  %v3528_v38 = vld [vmem:[#allocation64_spill] sm:$0xff]  ;;  %v2030_v46 = vpack.c.bf16 %v3531_v42, %v3530_v57  ;;  %v3532_v58 = vld [vmem:[#allocation66_spill] sm:$0xff]  ;;  %v3547_v35 = vld [vmem:[#allocation93_spill] sm:$0xff] }
 0x21e   : > { %v2028_v63 = vpack.c.bf16 %v3529_v0, %v3528_v38  ;;  %v2060_v54 = vpack.c.bf16 %v3533_v43, %v3532_v58  ;;  %v3550_v0 = vld [vmem:[#allocation91_spill] sm:$0xff]  ;;  %v3552_v57 = vld [vmem:[#allocation88_spill] sm:$0xff]  ;;  %v3554_v58 = vld [vmem:[#allocation97_spill] sm:$0xff] }
 0x21f   : > { %v3553_v42 = vld [vmem:[#allocation92_spill] sm:$0xff]  ;;  %v3555_v43 = vld [vmem:[#allocation101_spill] sm:$0xff] }
 0x220   : > { %1989 = vmatpush1.bf16.msra.mxu0 %v1988_v60  ;;  %2021 = vmatpush1.bf16.msra.mxu1 %v2020_v62  ;;  %v3534_v60 = vld [vmem:[#allocation75_spill] sm:$0xff]  ;;  %v3538_v62 = vld [vmem:[#allocation81_spill] sm:$0xff] }
 0x221   : > { %1991 = vmatprep.subr.bf16.mxu0 %v1990_v61  ;;  %2023 = vmatprep.subr.bf16.mxu1 %v2022_v53  ;;  %v2062_v47 = vpack.c.bf16 %v3535_v33, %v3534_v60  ;;  %v3536_v61 = vld [vmem:[#allocation72_spill] sm:$0xff]  ;;  %v2034_v36 = vpack.c.bf16 %v3539_v48, %v3538_v62  ;;  %v3540_v53 = vld [vmem:[#allocation74_spill] sm:$0xff] }
 0x222   : > { %v2032_v44 = vpack.c.bf16 %v3537_v37, %v3536_v61  ;;  %v2064_v50 = vpack.c.bf16 %v3541_v59, %v3540_v53  ;;  %v3556_v60 = vld [vmem:[#allocation90_spill] sm:$0xff]  ;;  %v3558_v61 = vld [vmem:[#allocation99_spill] sm:$0xff]  ;;  %v3560_v62 = vld [vmem:[#allocation96_spill] sm:$0xff] }
 0x223   : > { %v3557_v33 = vld [vmem:[#allocation94_spill] sm:$0xff]  ;;  %v3559_v37 = vld [vmem:[#allocation103_spill] sm:$0xff]  ;;  %v3561_v48 = vld [vmem:[#allocation100_spill] sm:$0xff] }
 0x224   : > { %1993 = vmatpush1.bf16.msra.mxu0 %v1992_v41  ;;  %2025 = vmatpush1.bf16.msra.mxu1 %v2024_v49  ;;  %v3542_v41 = vld [vmem:[#allocation83_spill] sm:$0xff]  ;;  %v3546_v49 = vld [vmem:[#allocation89_spill] sm:$0xff] }
 0x225   : > { %2027 = vmatprep.subr.bf16.mxu0 %v2026_v52  ;;  %2059 = vmatprep.subr.bf16.mxu1 %v2058_v29  ;;  %v2066_v45 = vpack.c.bf16 %v3543_v40, %v3542_v41  ;;  %v3544_v52 = vld [vmem:[#allocation80_spill] sm:$0xff]  ;;  %v2038_v25 = vpack.c.bf16 %v3547_v35, %v3546_v49  ;;  %v3549_v29 = vld [vmem:[#allocation86_spill] sm:$0xff]  ;;  %v3562_v53 = vld [vmem:[#allocation105_spill] sm:$0xff] }
 0x226   : > { %v2036_v56 = vpack.c.bf16 %v3545_v55, %v3544_v52  ;;  %v3563_v59 = vld [vmem:[#allocation109_spill] sm:$0xff]  ;;  %v3564_v41 = vld [vmem:[#allocation98_spill] sm:$0xff]  ;;  %v3566_v52 = vld [vmem:[#allocation107_spill] sm:$0xff] }
 0x227   : > { %1065 = vmatmul.mubr.f32.vlgmr.msra.gmra.mrb[0].mxu0 %v2497_v39  ;;  %1136 = vmatmul.mubr.f32.vlgmr.msra.gmra.mrb[0].mxu1 %v2497_v39  ;;  %v3548_v39 = vld [vmem:[#allocation82_spill] sm:$0xff]  ;;  %v3567_v55 = vld [vmem:[#allocation111_spill] sm:$0xff]  ;;  %v3568_v49 = vld [vmem:[#allocation104_spill] sm:$0xff] }
 0x228   : > { %2029 = vmatpush1.bf16.msra.mxu0 %v2028_v63  ;;  %1245 = vmatprep.mubr.f32.mxu0 %v2518_v27  ;;  %v2068_v38 = vpack.c.bf16 %v3549_v29, %v3548_v39  ;;  %v3551_v63 = vld [vmem:[#allocation95_spill] sm:$0xff]  ;;  %v3565_v40 = vld [vmem:[#allocation102_spill] sm:$0xff]  ;;  %v3569_v35 = vld [vmem:[#allocation108_spill] sm:$0xff] }
 0x229   : > { %2031 = vmatprep.subr.bf16.mxu0 %v2030_v46  ;;  %2061 = vmatpush1.bf16.msra.mxu1 %v2060_v54  ;;  %v2040_v46 = vpack.c.bf16 %v3553_v42, %v3552_v57  ;;  %v2042_v54 = vpack.c.bf16 %v3555_v43, %v3554_v58  ;;  %v3570_v39 = vld [vmem:[#allocation113_spill] sm:$0xff]  ;;  %v3574_v57 = vld [vmem:[#allocation115_spill] sm:$0xff]  ;;  %v3576_v58 = vld [vmem:[#allocation112_spill] sm:$0xff] }
 0x22a   : > { %1316 = vmatprep.mubr.f32.mxu1 %v2518_v27  ;;  %2063 = vmatprep.subr.bf16.mxu1 %v2062_v47  ;;  %v2070_v27 = vpack.c.bf16 %v3551_v63, %v3550_v0  ;;  %v2072_v47 = vpack.c.bf16 %v3557_v33, %v3556_v60  ;;  %v3571_v29 = vld [vmem:[#allocation117_spill] sm:$0xff]  ;;  %v3572_v0 = vld [vmem:[#allocation106_spill] sm:$0xff]  ;;  %v3575_v42 = vld [vmem:[#allocation119_spill] sm:$0xff] }
 0x22b   : > { %v3573_v63 = vld [vmem:[#allocation110_spill] sm:$0xff]  ;;  %v3577_v43 = vld [vmem:[#allocation116_spill] sm:$0xff]  ;;  %v3578_v60 = vld [vmem:[#allocation121_spill] sm:$0xff] }
 0x22c   : > { %2033 = vmatpush1.bf16.msra.mxu0 %v2032_v44  ;;  %v2074_v44 = vpack.c.bf16 %v3559_v37, %v3558_v61  ;;  %v3579_v33 = vld [vmem:[#allocation125_spill] sm:$0xff]  ;;  %v3580_v61 = vld [vmem:[#allocation114_spill] sm:$0xff] }
 0x22d   : > { %2035 = vmatprep.subr.bf16.mxu0 %v2034_v36  ;;  %2065 = vmatpush1.bf16.msra.mxu1 %v2064_v50  ;;  %v2044_v36 = vpack.c.bf16 %v3561_v48, %v3560_v62  ;;  %v2046_v50 = vpack.c.bf16 %v3563_v59, %v3562_v53  ;;  %v3581_v37 = vld [vmem:[#allocation118_spill] sm:$0xff]  ;;  %v3582_v62 = vld [vmem:[#allocation123_spill] sm:$0xff]  ;;  %v3584_v53 = vld [vmem:[#allocation120_spill] sm:$0xff] }
 0x22e   : > { %2067 = vmatprep.subr.bf16.mxu1 %v2066_v45  ;;  %v2076_v45 = vpack.c.bf16 %v3565_v40, %v3564_v41  ;;  %v3583_v48 = vld [vmem:[#allocation127_spill] sm:$0xff]  ;;  %v3585_v59 = vld [vmem:[#allocation124_spill] sm:$0xff]  ;;  %v3586_v41 = vld [vmem:[#allocation122_spill] sm:$0xff] }
 0x22f   : > { %v3587_v40 = vld [vmem:[#allocation126_spill] sm:$0xff] }
 0x230   : > { %2037 = vmatpush1.bf16.msra.mxu0 %v2036_v56  ;;  %v2078_v56 = vpack.c.bf16 %v3567_v55, %v3566_v52  ;;  %v996_v52 = vld [vmem:[%s995_s27] sm:$0xff]  ;;  %v997_v55 = vld [vmem:[%s995_s27 + $0x8] sm:$0xff] }
 0x231   : > { %2039 = vmatprep.subr.bf16.mxu0 %v2038_v25  ;;  %2069 = vmatpush1.bf16.msra.mxu1 %v2068_v38  ;;  %v2048_v25 = vpack.c.bf16 %v3569_v35, %v3568_v49  ;;  %v2050_v38 = vpack.c.bf16 %v3571_v29, %v3570_v39 }
 0x232   : > { %2071 = vmatprep.subr.bf16.mxu1 %v2070_v27  ;;  %v2080_v27 = vpack.c.bf16 %v3573_v63, %v3572_v0  ;;  %v999_v63 = vld [vmem:[%s995_s27 + $0x18] sm:$0xff] }
 0x234   : > { %2041 = vmatpush1.bf16.msra.mxu0 %v2040_v46  ;;  %v2082_v46 = vpack.c.bf16 %v3575_v42, %v3574_v57  ;;  %v998_v57 = vld [vmem:[%s995_s27 + $0x10] sm:$0xff] }
 0x235   : > { %2043 = vmatprep.subr.bf16.mxu0 %v2042_v54  ;;  %2073 = vmatpush1.bf16.msra.mxu1 %v2072_v47  ;;  %v2052_v54 = vpack.c.bf16 %v3577_v43, %v3576_v58  ;;  %v2054_v47 = vpack.c.bf16 %v3579_v33, %v3578_v60 }
 0x236   : > { %2075 = vmatprep.subr.bf16.mxu1 %v2074_v44  ;;  %v2084_v44 = vpack.c.bf16 %v3581_v37, %v3580_v61 }
 0x238   : > { %2045 = vmatpush1.bf16.msra.mxu0 %v2044_v36  ;;  %v2086_v36 = vpack.c.bf16 %v3583_v48, %v3582_v62  ;;  %v1177_v48 = vld [vmem:[%s1176_s22] sm:$0xff] }
 0x239   : > { %2047 = vmatprep.subr.bf16.mxu0 %v2046_v50  ;;  %2077 = vmatpush1.bf16.msra.mxu1 %v2076_v45  ;;  %v2056_v50 = vpack.c.bf16 %v3585_v59, %v3584_v53  ;;  %v2088_v45 = vpack.c.bf16 %v3587_v40, %v3586_v41 }
 0x23a   : > { %2079 = vmatprep.subr.bf16.mxu1 %v2078_v56 }
 0x23c   : > { %2049 = vmatpush1.bf16.msra.mxu0 %v2048_v25 }
 0x23d   : > { %2051 = vmatprep.subr.bf16.mxu0 %v2050_v38  ;;  %2081 = vmatpush1.bf16.msra.mxu1 %v2080_v27 }
 0x23e   : > { %2083 = vmatprep.subr.bf16.mxu1 %v2082_v46 }
 0x240   : > { %2053 = vmatpush1.bf16.msra.mxu0 %v2052_v54 }
 0x241   : > { %2055 = vmatprep.subr.bf16.mxu0 %v2054_v47  ;;  %2085 = vmatpush1.bf16.msra.mxu1 %v2084_v44 }
 0x242   : > { %2087 = vmatprep.subr.bf16.mxu1 %v2086_v36  ;;  %v1178_v36 = vld [vmem:[%s1176_s22 + $0x8] sm:$0xff] }
 0x244   : > { %2057 = vmatpush1.bf16.msra.mxu0 %v2056_v50 }
 0x245   : > { %2089 = vmatpush1.bf16.msra.mxu1 %v2088_v45 }
 0x247   : > { %1246 = vmatmul.mubr.f32.vlgmr.msra.gmra.mrb[2].mxu0 %v2489_v51 }
 0x248   : > { %1317 = vmatmul.mubr.f32.vlgmr.msra.gmra.mrb[2].mxu1 %v2489_v51 }
 0x2fa   : > { %v1066_v56 = vpop.f32.mrb[0].mxu0  ;;  %v1137_v39 = vpop.f32.mrb[0].mxu1 }
 0x2fb   : > { %v1142_v49 = vadd.f32 %v1066_v56, %v996_v52  ;;  %v1068_v35 = vpop.f32.mrb[1].mxu0  ;;  %v1139_v38 = vpop.f32.mrb[1].mxu1  ;;  %v1144_v51 = vadd.f32 %v1137_v39, %v998_v57  ;;  %v1180_v56 = vld [vmem:[%s1176_s22 + $0x18] sm:$0xff] }
 0x2fc   : > { %v1143_v25 = vadd.f32 %v1068_v35, %v997_v55  ;;  %v1145_v27 = vadd.f32 %v1139_v38, %v999_v63  ;;  %v1179_v35 = vld [vmem:[%s1176_s22 + $0x10] sm:$0xff]  ;;  %v1170_v38 = vld [vmem:[#allocation5] sm:$0xff] }
 0x2fd   : > { %v1667_v29 = vmul.f32 -1.442695, %v1142_v49 }
 0x2fe   : > { %v1668_v0 = vmul.f32 -1.442695, %v1143_v25  ;;  %v1669_v42 = vmul.f32 -1.442695, %v1145_v27 }
 0x2ff   : > { %2221 = vpow2.f32 %v1667_v29 }
 0x300   : > { %2223 = vpow2.f32 %v1668_v0 }
 0x301   : > { %2225 = vpow2.f32 %v1669_v42 }
 0x302   : > { %2227 = vtanh.f32 %v1144_v51 }
 0x309   : > { %v2222_v46 = vpop.eup %2221 }
 0x30a   : > { %v2224_v58 = vpop.eup %2223  ;;  %v1152_v43 = vadd.f32 1.0, %v2222_v46 }
 0x30b   : > { %v1153_v54 = vadd.f32 1.0, %v2224_v58  ;;  %v2226_v60 = vpop.eup %2225 }
 0x30c   : > { %2229 = vrcp.f32 %v1152_v43  ;;  %v2228_v33 = vpop.eup %2227  ;;  %v1162_v61 = vadd.f32 1.0, %v2226_v60 }
 0x30d   : > { %2231 = vrcp.f32 %v1153_v54 }
 0x30e   : > { %2233 = vrcp.f32 %v1162_v61 }
 0x316   : > { %v2230_v47 = vpop.eup %2229 }
 0x317   : > { %v2232_v37 = vpop.eup %2231  ;;  %v1166_v44 = vmul.f32 %v2230_v47, %v2228_v33 }
 0x318   : > { %v1165_v62 = vmul.f32 %v2493_v34, %v2232_v37  ;;  %v2234_v25 = vpop.eup %2233 }
 0x31a   : > { %v1167_v34 = vadd.f32 %v1166_v44, %v1165_v62   ;;  %v1247_v53 = vpop.f32.mrb[2].mxu0  ;;  %v1351_v62 = vld [vmem:[#allocation6] sm:$0xff] }
 0x31b   : > { %v1323_v59 = vadd.f32 %v1247_v53, %v1177_v48  ;;  %v1249_v50 = vpop.f32.mrb[3].mxu0  ;;  %v1318_v40 = vpop.f32.mrb[2].mxu1  ;;  %v1373_v53 = vld [vmem:[#allocation18 + $0x8] sm:$0xff] (%p985_p8) }
 0x31c   : > { %2235 = vtanh.f32 %v1167_v34  ;;  %v1324_v41 = vadd.f32 %v1249_v50, %v1178_v36  ;;  %v1320_v52 = vpop.f32.mrb[3].mxu1  ;;  %v1325_v0 = vadd.f32 %v1318_v40, %v1179_v35  ;;  %v1372_v36 = vld [vmem:[#allocation18] sm:$0xff] (%p985_p8)  ;;  %v2519_v50 = vmov (%p985_p8), 0.0|0.0   ;;  %v1356_v40 = vld [vmem:[#allocation16 + $0x8] sm:$0xff] (%p985_p8) }
 0x31d   : > { %v1672_v45 = vmul.f32 -1.442695, %v1323_v59  ;;  %v1326_v49 = vadd.f32 %v1320_v52, %v1180_v56  ;;  %v1355_v59 = vld [vmem:[#allocation16] sm:$0xff] (%p985_p8)  ;;  %2090 = vmatprep.subr.bf16.mxu0 (%p985_p8), %v2519_v50  ;;  %2114 = vmatprep.subr.bf16.mxu1 (%p985_p8), %v2519_v50  ;;  %v1375_v52 = vld [vmem:[#allocation18 + $0x18] sm:$0xff] (%p985_p8)  ;;  %v1357_v56 = vld [vmem:[#allocation16 + $0x10] sm:$0xff] (%p985_p8)  ;;  %v3589_v35 = vmov (%p985_p8), 0.0  }
 0x31e   : > { %v1673_v55 = vmul.f32 -1.442695, %v1324_v41  ;;  %v2091_v41 = vpack.c.bf16 (%p985_p8), %v1373_v53, %v1372_v36  ;;  %1761 = vmatprep.mubr.msk.f32.mxu0 (%p985_p8), %vm2520_vm0, %v3589_v35  ;;  %1796 = vmatprep.mubr.msk.f32.mxu1 (%p985_p8), %vm2520_vm0, %v3589_v35  ;;  %v1368_v34 = vld [vmem:[#allocation16 + $0x68] sm:$0xff] (%p985_p8)  ;;  %v1537_v36 = vld [vmem:[#allocation19 + $0x40] sm:$0xff] (%p985_p8) }
 0x31f   : > { %2237 = vpow2.f32 %v1672_v45  ;;  %v1674_v39 = vmul.f32 -1.442695, %v1326_v49  ;;  %v1374_v45 = vld [vmem:[#allocation18 + $0x10] sm:$0xff] (%p985_p8)  ;;  %v1358_v49 = vld [vmem:[#allocation16 + $0x18] sm:$0xff] (%p985_p8)  ;;  %v1538_v53 = vld [vmem:[#allocation19 + $0x48] sm:$0xff] (%p985_p8) }
 0x320   : > { %2239 = vpow2.f32 %v1673_v55  ;;  %v2115_v55 = vpack.c.bf16 (%p985_p8), %v1356_v40, %v1355_v59  ;;  %2092 = vmatpush3.bf16.msra.mxu0 (%p985_p8), %v2091_v41  ;;  %v2094_v1 = vpack.c.bf16 (%p985_p8), %v1375_v52, %v1374_v45  ;;  %v2118_v2 = vpack.c.bf16 (%p985_p8), %v1358_v49, %v1357_v56  ;;  %v1539_v41 = vld [vmem:[#allocation19 + $0x50] sm:$0xff] (%p985_p8)  ;;  %v1540_v40 = vld [vmem:[#allocation19 + $0x58] sm:$0xff] (%p985_p8)  ;;  %v1541_v52 = vld [vmem:[#allocation19 + $0x60] sm:$0xff] (%p985_p8) }
 0x321   : > { %2241 = vpow2.f32 %v1674_v39  ;;  %2093 = vmatprep.subr.bf16.mxu0 (%p985_p8), %v2519_v50  ;;  %v2151_v59 = vpack.c.bf16 (%p985_p8), %v1538_v53, %v1537_v36  ;;  %v2154_v45 = vpack.c.bf16 (%p985_p8), %v1540_v40, %v1539_v41  ;;  %v1543_v49 = vld [vmem:[#allocation19 + $0x70] sm:$0xff] (%p985_p8) }
 0x322   : > { %2243 = vtanh.f32 %v1325_v0  ;;  %2116 = vmatpush3.bf16.msra.mxu1 (%p985_p8), %v2115_v55  ;;  %v1369_v0 = vld [vmem:[#allocation16 + $0x70] sm:$0xff] (%p985_p8)  ;;  %v1542_v55 = vld [vmem:[#allocation19 + $0x68] sm:$0xff] (%p985_p8) }
 0x323   :  { %2117 = vmatprep.subr.bf16.mxu1 (%p985_p8), %v2519_v50  ;;  %v2157_v56 = vpack.c.bf16 (%p985_p8), %v1542_v55, %v1541_v52 }
 0x324   :  { %2095 = vmatpush3.bf16.msra.mxu0 (%p985_p8), %v2094_v1 }
 0x325   :  { %2096 = vmatprep.subr.bf16.mxu0 (%p985_p8), %v2519_v50 }
 0x326   : > { %v2236_v29 = vpop.eup %2235  ;;  %2119 = vmatpush3.bf16.msra.mxu1 (%p985_p8), %v2118_v2 }
 0x327   : > { %v1169_v63 = vmul.f32 %v2236_v29, %v2234_v25   ;;  %2120 = vmatprep.subr.bf16.mxu1 (%p985_p8), %v2519_v50  ;;  %v2109_v25 = vpack.c.bf16 (%p985_p8), %v1385_v32, %v1384_v30  ;;  %v1386_v29 = vld [vmem:[#allocation18 + $0x70] sm:$0xff] (%p985_p8) }
 0x328   :  { %2098 = vmatpush3.bf16.msra.mxu0 (%p985_p8), %v2097_v7 }
 0x329   : > { %v2238_v27 = vpop.eup %2237  ;;  %v1171_v57 = vmax.f32 %v1170_v38, %v1169_v63  ;;  %v3588_v39 = vmov %v1169_v63  ;;  %2099 = vmatprep.subr.bf16.mxu0 (%p985_p8), %v2519_v50  ;;  %v1387_v38 = vld [vmem:[#allocation18 + $0x78] sm:$0xff] (%p985_p8) }
 0x32a   : > { %v2240_v42 = vpop.eup %2239  ;;  %v1333_v51 = vadd.f32 1.0, %v2238_v27  ;;  %2122 = vmatpush3.bf16.msra.mxu1 (%p985_p8), %v2121_v8  ;;  %v1370_v63 = vld [vmem:[#allocation16 + $0x78] sm:$0xff] (%p985_p8)  ;;  %v2112_v27 = vpack.c.bf16 (%p985_p8), %v1387_v38, %v1386_v29 }
 0x32b   : > { %1172 = vst [vmem:[#allocation5] sm:$0xff] %v1171_v57  ;;  %v1334_v46 = vadd.f32 1.0, %v2240_v42  ;;  %v2242_v58 = vpop.eup %2241  ;;  %2123 = vmatprep.subr.bf16.mxu1 (%p985_p8), %v2519_v50  ;;  %v2136_v57 = vpack.c.bf16 (%p985_p8), %v1370_v63, %v1369_v0  ;;  %v1529_v42 = vld [vmem:[#allocation19] sm:$0xff] (%p985_p8) }
 0x32c   : > { %2245 = vrcp.f32 %v1333_v51  ;;  %v2244_v43 = vpop.eup %2243  ;;  %v1343_v60 = vadd.f32 1.0, %v2242_v58  ;;  %2101 = vmatpush3.bf16.msra.mxu0 (%p985_p8), %v2100_v13 }
 0x32d   : > { %2247 = vrcp.f32 %v1334_v46  ;;  %2102 = vmatprep.subr.bf16.mxu0 (%p985_p8), %v2519_v50 }
 0x32e   : > { %2249 = vrcp.f32 %v1343_v60  ;;  %2125 = vmatpush3.bf16.msra.mxu1 (%p985_p8), %v2124_v14  ;;  %v1532_v60 = vld [vmem:[#allocation19 + $0x18] sm:$0xff] (%p985_p8) }
 0x32f   :  { %2126 = vmatprep.subr.bf16.mxu1 (%p985_p8), %v2519_v50 }
 0x330   :  { %2104 = vmatpush3.bf16.msra.mxu0 (%p985_p8), %v2103_v19 }
 0x331   :  { %2105 = vmatprep.subr.bf16.mxu0 (%p985_p8), %v2519_v50 }
 0x332   :  { %2128 = vmatpush3.bf16.msra.mxu1 (%p985_p8), %v2127_v20  ;;  %v1371_v46 = vld [vmem:[#allocation5] sm:$0xff] (%p985_p8) }
 0x333   :  { %2129 = vmatprep.subr.bf16.mxu1 (%p985_p8), %v2519_v50 }
 0x334   :  { %2107 = vmatpush3.bf16.msra.mxu0 (%p985_p8), %v2106_v26 }
 0x335   :  { %2108 = vmatprep.subr.bf16.mxu0 (%p985_p8), %v2519_v50 }
 0x336   : > { %v2246_v54 = vpop.eup %2245  ;;  %2131 = vmatpush3.bf16.msra.mxu1 (%p985_p8), %v2130_v28 }
 0x337   : > { %v2248_v33 = vpop.eup %2247  ;;  %v1347_v47 = vmul.f32 %v2246_v54, %v2244_v43  ;;  %2132 = vmatprep.subr.bf16.mxu1 (%p985_p8), %v2519_v50  ;;  %v1354_v43 = vld [vmem:[#allocation4] sm:$0xff] (%p985_p8)  ;;  %v1531_v54 = vld [vmem:[#allocation19 + $0x10] sm:$0xff] (%p985_p8) }
 0x338   : > { %v1346_v61 = vmul.f32 %v2485_v31, %v2248_v33  ;;  %v2250_v37 = vpop.eup %2249  ;;  %2110 = vmatpush3.bf16.msra.mxu0 (%p985_p8), %v2109_v25  ;;  %v2142_v33 = vpack.c.bf16 (%p985_p8), %v1532_v60, %v1531_v54 }
 0x339   :  { %2111 = vmatprep.subr.bf16.mxu0 (%p985_p8), %v2519_v50 }
 0x33a   : > { %v1348_v31 = vadd.f32 %v1347_v47, %v1346_v61   ;;  %v1533_v47 = vld [vmem:[#allocation19 + $0x20] sm:$0xff] (%p985_p8)  ;;  %v1534_v61 = vld [vmem:[#allocation19 + $0x28] sm:$0xff] (%p985_p8) }
 0x33c   : > { %2251 = vtanh.f32 %v1348_v31  ;;  %v1367_v31 = vld [vmem:[#allocation16 + $0x60] sm:$0xff] (%p985_p8)  ;;  %2113 = vmatpush3.bf16.msra.mxu0 (%p985_p8), %v2112_v27 }
 0x33d   :  { %v2133_v39 = vpack.c.bf16 (%p985_p8), %v1368_v34, %v1367_v31  ;;  %2138 = vmatprep.subr.bf16.mxu0 (%p985_p8), %v2519_v50 }
 0x33f   :  { %2134 = vmatpush3.bf16.msra.mxu1 (%p985_p8), %v2133_v39  ;;  %1762 = vmatmul.mubr.f32.vlgmr.msra.gmra.mrb[0].mxu0 (%p985_p8), %v1371_v46 }
 0x340   :  { %2135 = vmatprep.subr.bf16.mxu1 (%p985_p8), %v2519_v50  ;;  %1831 = vmatprep.mubr.msk.f32.mxu0 (%p985_p8), %vm2520_vm0, %v3589_v35  ;;  %v1544_v35 = vld [vmem:[#allocation19 + $0x78] sm:$0xff] (%p985_p8) }
 0x341   :  { %v2160_v1 = vpack.c.bf16 (%p985_p8), %v1544_v35, %v1543_v49 }
 0x343   :  { %2137 = vmatpush3.bf16.msra.mxu1 (%p985_p8), %v2136_v57 }
 0x345   :  { %987 = sbr.rel (!%p985_p8) target bundleno = 517 (0x205), region = 97 }
 0x346   : > { %v2252_v44 = vpop.eup %2251  ;;  %1797 = vmatmul.mubr.f32.vlgmr.msra.gmra.mrb[0].mxu1 (%p985_p8), %v1354_v43 }
 0x347   : > { %v1350_v51 = vmul.f32 %v2252_v44, %v2250_v37   ;;  %v2145_v37 = vpack.c.bf16 (%p985_p8), %v1534_v61, %v1533_v47  ;;  %v1535_v44 = vld [vmem:[#allocation19 + $0x30] sm:$0xff] (%p985_p8) }
 0x349   : > { %v1352_v48 = vmax.f32 %v1351_v62, %v1350_v51  ;;  %v1530_v51 = vld [vmem:[#allocation19 + $0x8] sm:$0xff] (%p985_p8)  ;;  %v1536_v62 = vld [vmem:[#allocation19 + $0x38] sm:$0xff] (%p985_p8) }
 0x34a   :  { %v2139_v58 = vpack.c.bf16 (%p985_p8), %v1530_v51, %v1529_v42 }
 0x34b   : > { %1353 = vst [vmem:[#allocation6] sm:$0xff] %v1352_v48  ;;  %v2148_v48 = vpack.c.bf16 (%p985_p8), %v1536_v62, %v1535_v44 }
 0x34c   :  { %2140 = vmatpush3.bf16.msra.mxu0 %v2139_v58 }
 0x34d   :  { %2141 = vmatprep.subr.bf16.mxu0 %v2519_v50 }
 0x350   :  { %2143 = vmatpush3.bf16.msra.mxu0 %v2142_v33 }
 0x351   :  { %2144 = vmatprep.subr.bf16.mxu0 %v2519_v50 }
 0x352   :  { %v1528_v2 = vld [vmem:[#allocation6] sm:$0xff] }
 0x354   :  { %2146 = vmatpush3.bf16.msra.mxu0 %v2145_v37 }
 0x355   :  { %2147 = vmatprep.subr.bf16.mxu0 %v2519_v50 }
 0x358   :  { %2149 = vmatpush3.bf16.msra.mxu0 %v2148_v48 }
 0x359   :  { %2150 = vmatprep.subr.bf16.mxu0 %v2519_v50 }
 0x35c   :  { %2152 = vmatpush3.bf16.msra.mxu0 %v2151_v59 }
 0x35d   :  { %2153 = vmatprep.subr.bf16.mxu0 %v2519_v50 }
 0x360   :  { %2155 = vmatpush3.bf16.msra.mxu0 %v2154_v45 }
 0x361   :  { %2156 = vmatprep.subr.bf16.mxu0 %v2519_v50 }
 0x364   :  { %2158 = vmatpush3.bf16.msra.mxu0 %v2157_v56 }
 0x365   :  { %2159 = vmatprep.subr.bf16.mxu0 %v2519_v50 }
 0x368   :  { %2161 = vmatpush3.bf16.msra.mxu0 %v2160_v1 }
 0x36b   :  { %1832 = vmatmul.mubr.f32.vlgmr.msra.gmra.mrb[2].mxu0 %v1528_v2 }
 0x412   :  { %v1454_v3 = vpop.f32.mrb[0].mxu0 }
 0x413   :  { %v1763_v4 = vpop.f32.mrb[1].mxu0 }
 0x419   :  { %v1524_v5 = vpop.f32.mrb[0].mxu1 }
 0x41a   :  { %v1525_v6 = vadd.f32 %v1524_v5, %v1454_v3  ;;  %v1798_v7 = vpop.f32.mrb[1].mxu1 }
 0x43e   :  { %v1611_v8 = vpop.f32.mrb[2].mxu0 }
 0x43f   :  { %v1615_v10 = vadd.f32 %v1611_v8, %v1525_v6  ;;  %v1833_v11 = vpop.f32.mrb[3].mxu0 }
 0x441   :  { %v1623_v12 = vadd.f32 %v1675_v9, %v1615_v10 }
 0x443   :  { %1624 = vst [vmem:[#allocation21] sm:$0xff] %v1623_v12 }
 0x444   :  { %2440 = shalt.err (!%p2437_p13)
}
 0x445   :  { %s2441_s0 = scalar_lea.hbm %s3383_s9, 128 }
 0x446   :  { %p2442_p0 = scmp.ne.s32.totalorder %s3383_s9, %s2441_s0  ;;  %p2445_p1 = scmp.lt.u32.totalorder %s2441_s0, %s3383_s9 }
 0x448   :  { %p2447_p2 = pnand %p2445_p1, %p2442_p0 }
 0x44a   :  { %2450 = shalt.err (!%p2447_p2)
}
 0x44b   :  { %1634 = dma.vmem_to_hbm [thread:$0]  %s1632_s28, 128, %s3383_s9, [#allocation9]  }
 0x44c   :  { %2481 = dma.done.wait [#allocation9], 128  }
 0x44d   :  { %2482 = vsyncadd [#allocation9], 4294967168 }
 0x44e   :  { %1638 = vsyncpa [#allocation8], 1 }
 0x44f   :  { %1639 = vsyncpa [#allocation11], 1 }
 0x450   :  { %1640 = vsyncpa [#allocation14], 1 }
 0x451   :  { %1641 = vsyncpa [#allocation17], 1 }
 0x452   :  { %1642 = vsyncpa [#allocation20], 1 }
 0x453   :  { %1643 = vsyncpa [#allocation9], 1 }

</bundles_post_ra>
